<compile_context>
chip_gen: v7x
topology: tpu7x:2x2x1
jax: 0.10.0
libtpu: 0.0.40
codegen_flags: <defaults>
</compile_context>

<pallas_src>
import functools

import jax
import jax.numpy as jnp
import numpy as np
from jax.experimental import pallas as pl
from jax.experimental.pallas import tpu as pltpu


def _sigmoid(x):
    # tanh-based logistic: exact same math, guaranteed EUP lowering in Mosaic,
    # and identical formulation in kernel and reference.
    return 0.5 * (jnp.tanh(0.5 * x) + 1.0)


def gru_chunk_kernel(x_ref, wih_ref, whh_ref, bias_ref, bhn_ref, out_ref,
                     xw_scr, h_scr, *, unroll):
    """One (batch-chunk, time-chunk) grid step of the GRU recurrence.

    x_ref   : (tS, tB, D)  f32   time-major input chunk
    wih_ref : (D, 3H)      mm    W_ih^T  (input projection weights)
    whh_ref : (H, 3H)      mm    W_hh^T  (recurrent weights, loop-invariant)
    bias_ref: (1, 3H)      f32   fused biases (everything except b_hn)
    bhn_ref : (1, H)       f32   b_hn (must stay inside r * (...))
    out_ref : (tS, tB, H)  f32   hidden-state chunk, time-major
    xw_scr  : (tS, tB, 3H) f32   staged input projection for this chunk
    h_scr   : (tB, H)      f32   hidden state carried across time-chunks
    """
    tS, tB, D = x_ref.shape
    H = out_ref.shape[2]
    mm_dtype = whh_ref.dtype

    # New sequence (time-chunk 0 of this batch chunk): zero initial hidden.
    @pl.when(pl.program_id(1) == 0)
    def _():
        h_scr[...] = jnp.zeros_like(h_scr)

    # Fused input projection for the whole chunk: one (tS*tB, D) x (D, 3H)
    # MXU matmul (bf16 operands, f32 accumulation).  This avoids the xw HBM
    # round trip of a separate XLA einsum and actually fills the MXU, unlike
    # the small (tB, H) recurrent dot.
    xb = x_ref[...].reshape(tS * tB, D).astype(mm_dtype)
    xw = jnp.dot(xb, wih_ref[...], preferred_element_type=jnp.float32)
    xw_scr[...] = (xw + bias_ref[...]).reshape(tS, tB, 3 * H)

    # W_hh^T read once, kept as a loop-invariant value (weight push hoisted
    # out of the serial recurrence).
    whh = whh_ref[...]
    bhn = jnp.broadcast_to(bhn_ref[...], (tB, H))      # hoisted broadcast

    def step(t, h):
        xw_t = xw_scr[t]                               # (tB, 3H) f32
        hw = jnp.dot(h.astype(mm_dtype), whh,
                     preferred_element_type=jnp.float32)   # (tB, 3H) f32
        r = _sigmoid(xw_t[:, :H] + hw[:, :H])
        z = _sigmoid(xw_t[:, H:2 * H] + hw[:, H:2 * H])
        n = jnp.tanh(xw_t[:, 2 * H:] + r * (hw[:, 2 * H:] + bhn))
        h_new = (1.0 - z) * n + z * h
        out_ref[t] = h_new.astype(out_ref.dtype)
        return h_new

    # Partial unroll so the next step's xw load / out store / EUP pushes can
    # overlap the current step's MXU latency.
    h_scr[...] = jax.lax.fori_loop(0, tS, step, h_scr[...], unroll=unroll)


def vanilla_gru_forward(x, w_ih, w_hh, b_ih, b_hh, *, matmul_dtype=jnp.bfloat16):
    """VanillaGRU.forward.  x: (B, d_model, S) channels-first.

    w_ih, w_hh: (3H, H) PyTorch nn.GRU weights; b_ih, b_hh: (3H,).
    Returns (y, None) with y: (B, d_model, S).  Dropout(p=0.0) == Identity.
    matmul_dtype: MXU operand dtype (bf16 per review on v6e/v7x; f32 also ok).
    Gate math, carried hidden state and accumulation are always f32.
    """
    B, D, S = x.shape
    H = D
    f32 = jnp.float32
    # Sublane-aligned batch keeps the in-kernel (tS,tB,D)->(tS*tB,D) reshape a
    # pure layout no-op.  TODO(synk): pad ragged batches instead of asserting.
    assert B % 8 == 0, "batch must be a multiple of 8 (sublane alignment)"

    # Time-major input (replaces the module's own batch_first transpose);
    # weights pre-transposed so the kernel computes x @ W_ih^T / h @ W_hh^T.
    x_t = jnp.transpose(x, (2, 0, 1)).astype(f32)            # (S, B, D)
    wih_t = jnp.transpose(w_ih).astype(matmul_dtype)         # (D, 3H)
    whh_t = jnp.transpose(w_hh).astype(matmul_dtype)         # (H, 3H)
    b_ih = b_ih.astype(f32)
    b_hh = b_hh.astype(f32)
    # r/z gates absorb b_ih + b_hh; n gate absorbs only b_in (b_hn stays in-kernel).
    fused_bias = jnp.concatenate(
        [b_ih[:2 * H] + b_hh[:2 * H], b_ih[2 * H:]]).reshape(1, 3 * H)
    b_hn = b_hh[2 * H:].reshape(1, H)

    # ---- tile selection --------------------------------------------------
    # >=2 batch chunks when possible so dimension_semantics=("parallel", ...)
    # can shard them onto v7x's two TensorCores (harmless no-op on v5e/v6e).
    tB = B // 2 if (B % 16 == 0) else B
    mm_bytes = np.dtype(matmul_dtype).itemsize

    def footprint(ts):
        return (2 * ts * tB * D * 4                 # x blocks (double-buffered)
                + 2 * ts * tB * H * 4               # out blocks (double-buffered)
                + 2 * (D + H) * 3 * H * mm_bytes    # weights
                + 2 * 4 * H * 4                     # biases
                + ts * tB * 3 * H * 4               # xw scratch
                + tB * H * 4)                       # hidden-state scratch

    # Largest divisor of S whose VMEM footprint fits ~24 MiB (scales to v7x's
    # 64 MiB physical VMEM and v5e's 16 MiB default scoped limit).
    tS = S
    for cand in (512, 256, 128, 64, 32, 16, 8, 4, 2, 1):
        if S % cand == 0:
            tS = cand
            if footprint(cand) <= (24 << 20):
                break

    grid = (B // tB, S // tS)
    vmem_limit = int(min(max(footprint(tS) * 3 // 2 + (2 << 20), 8 << 20),
                         64 << 20))

    kernel = functools.partial(gru_chunk_kernel, unroll=min(8, tS))

    out_sbh = pl.pallas_call(
        kernel,
        out_shape=jax.ShapeDtypeStruct((S, B, H), f32),
        grid_spec=pltpu.PrefetchScalarGridSpec(
            num_scalar_prefetch=0,
            grid=grid,
            in_specs=[
                pl.BlockSpec((tS, tB, D), lambda b, s: (s, b, 0)),    # x chunk
                pl.BlockSpec((D, 3 * H), lambda b, s: (0, 0)),        # W_ih^T
                pl.BlockSpec((H, 3 * H), lambda b, s: (0, 0)),        # W_hh^T
                pl.BlockSpec((1, 3 * H), lambda b, s: (0, 0)),        # fused bias
                pl.BlockSpec((1, H), lambda b, s: (0, 0)),            # b_hn
            ],
            out_specs=pl.BlockSpec((tS, tB, H), lambda b, s: (s, b, 0)),
            scratch_shapes=[
                pltpu.VMEM((tS, tB, 3 * H), f32),   # staged input projection
                pltpu.VMEM((tB, H), f32),           # carried hidden state
            ],
        ),
        compiler_params=pltpu.CompilerParams(
            dimension_semantics=("parallel", "arbitrary"),
            vmem_limit_bytes=vmem_limit,
        ),
    )(x_t, wih_t, whh_t, fused_bias, b_hn)

    # Single remaining layout change: (S, B, H) -> (B, H, S) channels-first.
    y = jnp.transpose(out_sbh, (1, 2, 0))
    # nn.GRU's final hidden state is discarded by the module -> return None.
    return y, None


def _reference_forward(x, w_ih, w_hh, b_ih, b_hh):
    """Pure-JAX reference mirroring torch.nn.GRU (batch_first) + the transposes."""
    B, D, S = x.shape
    H = D
    x_sbd = jnp.transpose(x, (2, 0, 1)).astype(jnp.float32)   # (S, B, D)

    def step(h, x_t):
        gi = x_t @ w_ih.T + b_ih
        gh = h @ w_hh.T + b_hh
        r = _sigmoid(gi[:, :H] + gh[:, :H])
        z = _sigmoid(gi[:, H:2 * H] + gh[:, H:2 * H])
        n = jnp.tanh(gi[:, 2 * H:] + r * gh[:, 2 * H:])
        h_new = (1.0 - z) * n + z * h
        return h_new, h_new

    h0 = jnp.zeros((B, H), jnp.float32)
    _, ys = jax.lax.scan(step, h0, x_sbd)                      # (S, B, H)
    return jnp.transpose(ys, (1, 2, 0))                        # (B, H, S)


if __name__ == "__main__":
    d_model = 128    # H == D (lane aligned)
    batch = 8        # B (sublane aligned)
    seq = 8          # S

    key = jax.random.PRNGKey(0)
    kx, k1, k2, k3, k4 = jax.random.split(key, 5)

    # PyTorch nn.GRU default init: U(-1/sqrt(H), 1/sqrt(H))
    bound = 1.0 / np.sqrt(d_model)
    x = jax.random.normal(kx, (batch, d_model, seq), dtype=jnp.float32)
    w_ih = jax.random.uniform(k1, (3 * d_model, d_model), jnp.float32, -bound, bound)
    w_hh = jax.random.uniform(k2, (3 * d_model, d_model), jnp.float32, -bound, bound)
    b_ih = jax.random.uniform(k3, (3 * d_model,), jnp.float32, -bound, bound)
    b_hh = jax.random.uniform(k4, (3 * d_model,), jnp.float32, -bound, bound)

    ref = _reference_forward(x, w_ih, w_hh, b_ih, b_hh)

    # Default path: bf16 MXU operands, f32 gate math / accumulation.
    y_bf16, hidden = jax.jit(vanilla_gru_forward)(x, w_ih, w_hh, b_ih, b_hh)
    y_bf16 = jax.block_until_ready(y_bf16)
    assert hidden is None
    np.testing.assert_allclose(np.asarray(y_bf16), np.asarray(ref),
                               rtol=5e-3, atol=5e-3)

    # Full-f32 MXU path: matches the f32 reference tightly.
    fwd_f32 = jax.jit(functools.partial(vanilla_gru_forward,
                                        matmul_dtype=jnp.float32))
    y_f32, hidden_f32 = fwd_f32(x, w_ih, w_hh, b_ih, b_hh)
    y_f32 = jax.block_until_ready(y_f32)
    assert hidden_f32 is None
    np.testing.assert_allclose(np.asarray(y_f32), np.asarray(ref),
                               rtol=1e-4, atol=1e-4)

    print("KERNEL_OK")
</pallas_src>

<mosaic_0001>
module attributes {stable_mosaic.version = 11 : i64} {
  func.func @gru_chunk_kernel(%arg0: i32, %arg1: i32, %arg2: memref<8x8x128xf32, #tpu.memory_space<vmem>>, %arg3: memref<128x384xbf16, #tpu.memory_space<vmem>>, %arg4: memref<128x384xbf16, #tpu.memory_space<vmem>>, %arg5: memref<1x384xf32, #tpu.memory_space<vmem>>, %arg6: memref<1x128xf32, #tpu.memory_space<vmem>>, %arg7: memref<8x8x128xf32, #tpu.memory_space<vmem>>, %arg8: memref<8x8x384xf32, #tpu.memory_space<vmem>>, %arg9: memref<8x128xf32, #tpu.memory_space<vmem>>) attributes {dimension_semantics = [#tpu.dimension_semantics<parallel>, #tpu.dimension_semantics<arbitrary>], iteration_bounds = array<i64: 1, 1>, scalar_prefetch = 0 : i64, scratch_operands = 2 : i64, tpu.core_type = #tpu.core_type<tc>, window_params = [{transform_indices = @transform_0, window_bounds = array<i64: 8, 8, 128>}, {pipeline_mode = #tpu.pipeline_mode<synchronous>, transform_indices = @transform_1, window_bounds = array<i64: 128, 384>}, {pipeline_mode = #tpu.pipeline_mode<synchronous>, transform_indices = @transform_2, window_bounds = array<i64: 128, 384>}, {pipeline_mode = #tpu.pipeline_mode<synchronous>, transform_indices = @transform_3, window_bounds = array<i64: 1, 384>}, {pipeline_mode = #tpu.pipeline_mode<synchronous>, transform_indices = @transform_4, window_bounds = array<i64: 1, 128>}, {transform_indices = @transform_5, window_bounds = array<i64: 8, 8, 128>}]} {
    %c0_i32 = arith.constant 0 : i32
    %0 = arith.cmpi eq, %arg1, %c0_i32 : i32
    %1 = arith.extui %0 : i1 to i32
    %c0_i32_0 = arith.constant 0 : i32
    %2 = arith.cmpi ne, %1, %c0_i32_0 : i32
    scf.if %2 {
      %cst_115 = arith.constant 0.000000e+00 : f32
      %339 = vector.broadcast %cst_115 : f32 to vector<8x128xf32>
      %c0_116 = arith.constant 0 : index
      %c0_117 = arith.constant 0 : index
      %340 = vector.load %arg9[%c0_116, %c0_117] : memref<8x128xf32, #tpu.memory_space<vmem>>, vector<8x128xf32>
      tpu.vector_store %arg9[%c0_116, %c0_117], %339 {strides = array<i32>} : memref<8x128xf32, #tpu.memory_space<vmem>>, vector<8x128xf32>,
    } else {
    }
    %c0 = arith.constant 0 : index
    %c0_1 = arith.constant 0 : index
    %c0_2 = arith.constant 0 : index
    %3 = vector.load %arg2[%c0, %c0_1, %c0_2] : memref<8x8x128xf32, #tpu.memory_space<vmem>>, vector<8x8x128xf32>
    %4 = vector.shape_cast %3 : vector<8x8x128xf32> to vector<64x128xf32>
    %5 = arith.truncf %4 : vector<64x128xf32> to vector<64x128xbf16>
    %c0_3 = arith.constant 0 : index
    %c0_4 = arith.constant 0 : index
    %6 = vector.load %arg3[%c0_3, %c0_4] : memref<128x384xbf16, #tpu.memory_space<vmem>>, vector<128x384xbf16>
    %cst = arith.constant dense<0.000000e+00> : vector<64x384xf32>
    %7 = tpu.matmul %5, %6, %cst {dimension_numbers = #tpu.dot_dimension_numbers<[1], [0], [0], [1], [0, 0, 1, 1], [], []>} : vector<64x128xbf16>, vector<128x384xbf16>, vector<64x384xf32> -> vector<64x384xf32>
    %c0_5 = arith.constant 0 : index
    %c0_6 = arith.constant 0 : index
    %8 = vector.load %arg5[%c0_5, %c0_6] : memref<1x384xf32, #tpu.memory_space<vmem>>, vector<1x384xf32>
    %9 = vector.broadcast %8 : vector<1x384xf32> to vector<64x384xf32>
    %10 = arith.addf %7, %9 : vector<64x384xf32>
    %11 = vector.shape_cast %10 : vector<64x384xf32> to vector<8x8x384xf32>
    %c0_7 = arith.constant 0 : index
    %c0_8 = arith.constant 0 : index
    %c0_9 = arith.constant 0 : index
    %12 = vector.load %arg8[%c0_7, %c0_8, %c0_9] : memref<8x8x384xf32, #tpu.memory_space<vmem>>, vector<8x8x384xf32>
    tpu.vector_store %arg8[%c0_7, %c0_8, %c0_9], %11 {strides = array<i32>} : memref<8x8x384xf32, #tpu.memory_space<vmem>>, vector<8x8x384xf32>,
    %c0_10 = arith.constant 0 : index
    %c0_11 = arith.constant 0 : index
    %13 = vector.load %arg4[%c0_10, %c0_11] : memref<128x384xbf16, #tpu.memory_space<vmem>>, vector<128x384xbf16>
    %c0_12 = arith.constant 0 : index
    %c0_13 = arith.constant 0 : index
    %14 = vector.load %arg6[%c0_12, %c0_13] : memref<1x128xf32, #tpu.memory_space<vmem>>, vector<1x128xf32>
    %15 = vector.shape_cast %14 : vector<1x128xf32> to vector<1x128xf32>
    %16 = vector.broadcast %15 : vector<1x128xf32> to vector<8x128xf32>
    %c0_14 = arith.constant 0 : index
    %c0_15 = arith.constant 0 : index
    %17 = vector.load %arg9[%c0_14, %c0_15] : memref<8x128xf32, #tpu.memory_space<vmem>>, vector<8x128xf32>
    %c0_i32_16 = arith.constant 0 : i32
    %18 = arith.index_cast %c0_i32_16 : i32 to index
    %c0_17 = arith.constant 0 : index
    %c0_18 = arith.constant 0 : index
    %19 = vector.load %arg8[%18, %c0_17, %c0_18] : memref<8x8x384xf32, #tpu.memory_space<vmem>>, vector<1x8x384xf32>
    %20 = vector.shape_cast %19 : vector<1x8x384xf32> to vector<8x384xf32>
    %21 = arith.truncf %17 : vector<8x128xf32> to vector<8x128xbf16>
    %cst_19 = arith.constant dense<0.000000e+00> : vector<8x384xf32>
    %22 = tpu.matmul %21, %13, %cst_19 {dimension_numbers = #tpu.dot_dimension_numbers<[1], [0], [0], [1], [0, 0, 1, 1], [], []>} : vector<8x128xbf16>, vector<128x384xbf16>, vector<8x384xf32> -> vector<8x384xf32>
    %23 = vector.extract_strided_slice %20 {offsets = [0, 0], sizes = [8, 128], strides = [1, 1]} : vector<8x384xf32> to vector<8x128xf32>
    %24 = vector.extract_strided_slice %22 {offsets = [0, 0], sizes = [8, 128], strides = [1, 1]} : vector<8x384xf32> to vector<8x128xf32>
    %25 = arith.addf %23, %24 : vector<8x128xf32>
    %cst_20 = arith.constant 5.000000e-01 : f32
    %26 = vector.broadcast %cst_20 : f32 to vector<8x128xf32>
    %27 = arith.mulf %26, %25 : vector<8x128xf32>
    %28 = math.tanh %27 : vector<8x128xf32>
    %cst_21 = arith.constant 1.000000e+00 : f32
    %29 = vector.broadcast %cst_21 : f32 to vector<8x128xf32>
    %30 = arith.addf %28, %29 : vector<8x128xf32>
    %cst_22 = arith.constant 5.000000e-01 : f32
    %31 = vector.broadcast %cst_22 : f32 to vector<8x128xf32>
    %32 = arith.mulf %31, %30 : vector<8x128xf32>
    %33 = vector.extract_strided_slice %20 {offsets = [0, 128], sizes = [8, 128], strides = [1, 1]} : vector<8x384xf32> to vector<8x128xf32>
    %34 = vector.extract_strided_slice %22 {offsets = [0, 128], sizes = [8, 128], strides = [1, 1]} : vector<8x384xf32> to vector<8x128xf32>
    %35 = arith.addf %33, %34 : vector<8x128xf32>
    %cst_23 = arith.constant 5.000000e-01 : f32
    %36 = vector.broadcast %cst_23 : f32 to vector<8x128xf32>
    %37 = arith.mulf %36, %35 : vector<8x128xf32>
    %38 = math.tanh %37 : vector<8x128xf32>
    %cst_24 = arith.constant 1.000000e+00 : f32
    %39 = vector.broadcast %cst_24 : f32 to vector<8x128xf32>
    %40 = arith.addf %38, %39 : vector<8x128xf32>
    %cst_25 = arith.constant 5.000000e-01 : f32
    %41 = vector.broadcast %cst_25 : f32 to vector<8x128xf32>
    %42 = arith.mulf %41, %40 : vector<8x128xf32>
    %43 = vector.extract_strided_slice %20 {offsets = [0, 256], sizes = [8, 128], strides = [1, 1]} : vector<8x384xf32> to vector<8x128xf32>
    %44 = vector.extract_strided_slice %22 {offsets = [0, 256], sizes = [8, 128], strides = [1, 1]} : vector<8x384xf32> to vector<8x128xf32>
    %45 = arith.addf %44, %16 : vector<8x128xf32>
    %46 = arith.mulf %32, %45 : vector<8x128xf32>
    %47 = arith.addf %43, %46 : vector<8x128xf32>
    %48 = math.tanh %47 : vector<8x128xf32>
    %cst_26 = arith.constant 1.000000e+00 : f32
    %49 = vector.broadcast %cst_26 : f32 to vector<8x128xf32>
    %50 = arith.subf %49, %42 : vector<8x128xf32>
    %51 = arith.mulf %50, %48 : vector<8x128xf32>
    %52 = arith.mulf %42, %17 : vector<8x128xf32>
    %53 = arith.addf %51, %52 : vector<8x128xf32>
    %54 = arith.index_cast %c0_i32_16 : i32 to index
    %c0_27 = arith.constant 0 : index
    %c0_28 = arith.constant 0 : index
    %55 = vector.load %arg7[%54, %c0_27, %c0_28] : memref<8x8x128xf32, #tpu.memory_space<vmem>>, vector<1x8x128xf32>
    %56 = vector.shape_cast %55 : vector<1x8x128xf32> to vector<8x128xf32>
    %57 = vector.shape_cast %53 : vector<8x128xf32> to vector<1x8x128xf32>
    tpu.vector_store %arg7[%54, %c0_27, %c0_28], %57 {strides = array<i32>} : memref<8x8x128xf32, #tpu.memory_space<vmem>>, vector<1x8x128xf32>,
    %c1_i32 = arith.constant 1 : i32
    %58 = arith.index_cast %c1_i32 : i32 to index
    %c0_29 = arith.constant 0 : index
    %c0_30 = arith.constant 0 : index
    %59 = vector.load %arg8[%58, %c0_29, %c0_30] : memref<8x8x384xf32, #tpu.memory_space<vmem>>, vector<1x8x384xf32>
    %60 = vector.shape_cast %59 : vector<1x8x384xf32> to vector<8x384xf32>
    %61 = arith.truncf %53 : vector<8x128xf32> to vector<8x128xbf16>
    %cst_31 = arith.constant dense<0.000000e+00> : vector<8x384xf32>
    %62 = tpu.matmul %61, %13, %cst_31 {dimension_numbers = #tpu.dot_dimension_numbers<[1], [0], [0], [1], [0, 0, 1, 1], [], []>} : vector<8x128xbf16>, vector<128x384xbf16>, vector<8x384xf32> -> vector<8x384xf32>
    %63 = vector.extract_strided_slice %60 {offsets = [0, 0], sizes = [8, 128], strides = [1, 1]} : vector<8x384xf32> to vector<8x128xf32>
    %64 = vector.extract_strided_slice %62 {offsets = [0, 0], sizes = [8, 128], strides = [1, 1]} : vector<8x384xf32> to vector<8x128xf32>
    %65 = arith.addf %63, %64 : vector<8x128xf32>
    %cst_32 = arith.constant 5.000000e-01 : f32
    %66 = vector.broadcast %cst_32 : f32 to vector<8x128xf32>
    %67 = arith.mulf %66, %65 : vector<8x128xf32>
    %68 = math.tanh %67 : vector<8x128xf32>
    %cst_33 = arith.constant 1.000000e+00 : f32
    %69 = vector.broadcast %cst_33 : f32 to vector<8x128xf32>
    %70 = arith.addf %68, %69 : vector<8x128xf32>
    %cst_34 = arith.constant 5.000000e-01 : f32
    %71 = vector.broadcast %cst_34 : f32 to vector<8x128xf32>
    %72 = arith.mulf %71, %70 : vector<8x128xf32>
    %73 = vector.extract_strided_slice %60 {offsets = [0, 128], sizes = [8, 128], strides = [1, 1]} : vector<8x384xf32> to vector<8x128xf32>
    %74 = vector.extract_strided_slice %62 {offsets = [0, 128], sizes = [8, 128], strides = [1, 1]} : vector<8x384xf32> to vector<8x128xf32>
    %75 = arith.addf %73, %74 : vector<8x128xf32>
    %cst_35 = arith.constant 5.000000e-01 : f32
    %76 = vector.broadcast %cst_35 : f32 to vector<8x128xf32>
    %77 = arith.mulf %76, %75 : vector<8x128xf32>
    %78 = math.tanh %77 : vector<8x128xf32>
    %cst_36 = arith.constant 1.000000e+00 : f32
    %79 = vector.broadcast %cst_36 : f32 to vector<8x128xf32>
    %80 = arith.addf %78, %79 : vector<8x128xf32>
    %cst_37 = arith.constant 5.000000e-01 : f32
    %81 = vector.broadcast %cst_37 : f32 to vector<8x128xf32>
    %82 = arith.mulf %81, %80 : vector<8x128xf32>
    %83 = vector.extract_strided_slice %60 {offsets = [0, 256], sizes = [8, 128], strides = [1, 1]} : vector<8x384xf32> to vector<8x128xf32>
    %84 = vector.extract_strided_slice %62 {offsets = [0, 256], sizes = [8, 128], strides = [1, 1]} : vector<8x384xf32> to vector<8x128xf32>
    %85 = arith.addf %84, %16 : vector<8x128xf32>
    %86 = arith.mulf %72, %85 : vector<8x128xf32>
    %87 = arith.addf %83, %86 : vector<8x128xf32>
    %88 = math.tanh %87 : vector<8x128xf32>
    %cst_38 = arith.constant 1.000000e+00 : f32
    %89 = vector.broadcast %cst_38 : f32 to vector<8x128xf32>
    %90 = arith.subf %89, %82 : vector<8x128xf32>
    %91 = arith.mulf %90, %88 : vector<8x128xf32>
    %92 = arith.mulf %82, %53 : vector<8x128xf32>
    %93 = arith.addf %91, %92 : vector<8x128xf32>
    %94 = arith.index_cast %c1_i32 : i32 to index
    %c0_39 = arith.constant 0 : index
    %c0_40 = arith.constant 0 : index
    %95 = vector.load %arg7[%94, %c0_39, %c0_40] : memref<8x8x128xf32, #tpu.memory_space<vmem>>, vector<1x8x128xf32>
    %96 = vector.shape_cast %95 : vector<1x8x128xf32> to vector<8x128xf32>
    %97 = vector.shape_cast %93 : vector<8x128xf32> to vector<1x8x128xf32>
    tpu.vector_store %arg7[%94, %c0_39, %c0_40], %97 {strides = array<i32>} : memref<8x8x128xf32, #tpu.memory_space<vmem>>, vector<1x8x128xf32>,
    %c2_i32 = arith.constant 2 : i32
    %98 = arith.index_cast %c2_i32 : i32 to index
    %c0_41 = arith.constant 0 : index
    %c0_42 = arith.constant 0 : index
    %99 = vector.load %arg8[%98, %c0_41, %c0_42] : memref<8x8x384xf32, #tpu.memory_space<vmem>>, vector<1x8x384xf32>
    %100 = vector.shape_cast %99 : vector<1x8x384xf32> to vector<8x384xf32>
    %101 = arith.truncf %93 : vector<8x128xf32> to vector<8x128xbf16>
    %cst_43 = arith.constant dense<0.000000e+00> : vector<8x384xf32>
    %102 = tpu.matmul %101, %13, %cst_43 {dimension_numbers = #tpu.dot_dimension_numbers<[1], [0], [0], [1], [0, 0, 1, 1], [], []>} : vector<8x128xbf16>, vector<128x384xbf16>, vector<8x384xf32> -> vector<8x384xf32>
    %103 = vector.extract_strided_slice %100 {offsets = [0, 0], sizes = [8, 128], strides = [1, 1]} : vector<8x384xf32> to vector<8x128xf32>
    %104 = vector.extract_strided_slice %102 {offsets = [0, 0], sizes = [8, 128], strides = [1, 1]} : vector<8x384xf32> to vector<8x128xf32>
    %105 = arith.addf %103, %104 : vector<8x128xf32>
    %cst_44 = arith.constant 5.000000e-01 : f32
    %106 = vector.broadcast %cst_44 : f32 to vector<8x128xf32>
    %107 = arith.mulf %106, %105 : vector<8x128xf32>
    %108 = math.tanh %107 : vector<8x128xf32>
    %cst_45 = arith.constant 1.000000e+00 : f32
    %109 = vector.broadcast %cst_45 : f32 to vector<8x128xf32>
    %110 = arith.addf %108, %109 : vector<8x128xf32>
    %cst_46 = arith.constant 5.000000e-01 : f32
    %111 = vector.broadcast %cst_46 : f32 to vector<8x128xf32>
    %112 = arith.mulf %111, %110 : vector<8x128xf32>
    %113 = vector.extract_strided_slice %100 {offsets = [0, 128], sizes = [8, 128], strides = [1, 1]} : vector<8x384xf32> to vector<8x128xf32>
    %114 = vector.extract_strided_slice %102 {offsets = [0, 128], sizes = [8, 128], strides = [1, 1]} : vector<8x384xf32> to vector<8x128xf32>
    %115 = arith.addf %113, %114 : vector<8x128xf32>
    %cst_47 = arith.constant 5.000000e-01 : f32
    %116 = vector.broadcast %cst_47 : f32 to vector<8x128xf32>
    %117 = arith.mulf %116, %115 : vector<8x128xf32>
    %118 = math.tanh %117 : vector<8x128xf32>
    %cst_48 = arith.constant 1.000000e+00 : f32
    %119 = vector.broadcast %cst_48 : f32 to vector<8x128xf32>
    %120 = arith.addf %118, %119 : vector<8x128xf32>
    %cst_49 = arith.constant 5.000000e-01 : f32
    %121 = vector.broadcast %cst_49 : f32 to vector<8x128xf32>
    %122 = arith.mulf %121, %120 : vector<8x128xf32>
    %123 = vector.extract_strided_slice %100 {offsets = [0, 256], sizes = [8, 128], strides = [1, 1]} : vector<8x384xf32> to vector<8x128xf32>
    %124 = vector.extract_strided_slice %102 {offsets = [0, 256], sizes = [8, 128], strides = [1, 1]} : vector<8x384xf32> to vector<8x128xf32>
    %125 = arith.addf %124, %16 : vector<8x128xf32>
    %126 = arith.mulf %112, %125 : vector<8x128xf32>
    %127 = arith.addf %123, %126 : vector<8x128xf32>
    %128 = math.tanh %127 : vector<8x128xf32>
    %cst_50 = arith.constant 1.000000e+00 : f32
    %129 = vector.broadcast %cst_50 : f32 to vector<8x128xf32>
    %130 = arith.subf %129, %122 : vector<8x128xf32>
    %131 = arith.mulf %130, %128 : vector<8x128xf32>
    %132 = arith.mulf %122, %93 : vector<8x128xf32>
    %133 = arith.addf %131, %132 : vector<8x128xf32>
    %134 = arith.index_cast %c2_i32 : i32 to index
    %c0_51 = arith.constant 0 : index
    %c0_52 = arith.constant 0 : index
    %135 = vector.load %arg7[%134, %c0_51, %c0_52] : memref<8x8x128xf32, #tpu.memory_space<vmem>>, vector<1x8x128xf32>
    %136 = vector.shape_cast %135 : vector<1x8x128xf32> to vector<8x128xf32>
    %137 = vector.shape_cast %133 : vector<8x128xf32> to vector<1x8x128xf32>
    tpu.vector_store %arg7[%134, %c0_51, %c0_52], %137 {strides = array<i32>} : memref<8x8x128xf32, #tpu.memory_space<vmem>>, vector<1x8x128xf32>,
    %c3_i32 = arith.constant 3 : i32
    %138 = arith.index_cast %c3_i32 : i32 to index
    %c0_53 = arith.constant 0 : index
    %c0_54 = arith.constant 0 : index
    %139 = vector.load %arg8[%138, %c0_53, %c0_54] : memref<8x8x384xf32, #tpu.memory_space<vmem>>, vector<1x8x384xf32>
    %140 = vector.shape_cast %139 : vector<1x8x384xf32> to vector<8x384xf32>
    %141 = arith.truncf %133 : vector<8x128xf32> to vector<8x128xbf16>
    %cst_55 = arith.constant dense<0.000000e+00> : vector<8x384xf32>
    %142 = tpu.matmul %141, %13, %cst_55 {dimension_numbers = #tpu.dot_dimension_numbers<[1], [0], [0], [1], [0, 0, 1, 1], [], []>} : vector<8x128xbf16>, vector<128x384xbf16>, vector<8x384xf32> -> vector<8x384xf32>
    %143 = vector.extract_strided_slice %140 {offsets = [0, 0], sizes = [8, 128], strides = [1, 1]} : vector<8x384xf32> to vector<8x128xf32>
    %144 = vector.extract_strided_slice %142 {offsets = [0, 0], sizes = [8, 128], strides = [1, 1]} : vector<8x384xf32> to vector<8x128xf32>
    %145 = arith.addf %143, %144 : vector<8x128xf32>
    %cst_56 = arith.constant 5.000000e-01 : f32
    %146 = vector.broadcast %cst_56 : f32 to vector<8x128xf32>
    %147 = arith.mulf %146, %145 : vector<8x128xf32>
    %148 = math.tanh %147 : vector<8x128xf32>
    %cst_57 = arith.constant 1.000000e+00 : f32
    %149 = vector.broadcast %cst_57 : f32 to vector<8x128xf32>
    %150 = arith.addf %148, %149 : vector<8x128xf32>
    %cst_58 = arith.constant 5.000000e-01 : f32
    %151 = vector.broadcast %cst_58 : f32 to vector<8x128xf32>
    %152 = arith.mulf %151, %150 : vector<8x128xf32>
    %153 = vector.extract_strided_slice %140 {offsets = [0, 128], sizes = [8, 128], strides = [1, 1]} : vector<8x384xf32> to vector<8x128xf32>
    %154 = vector.extract_strided_slice %142 {offsets = [0, 128], sizes = [8, 128], strides = [1, 1]} : vector<8x384xf32> to vector<8x128xf32>
    %155 = arith.addf %153, %154 : vector<8x128xf32>
    %cst_59 = arith.constant 5.000000e-01 : f32
    %156 = vector.broadcast %cst_59 : f32 to vector<8x128xf32>
    %157 = arith.mulf %156, %155 : vector<8x128xf32>
    %158 = math.tanh %157 : vector<8x128xf32>
    %cst_60 = arith.constant 1.000000e+00 : f32
    %159 = vector.broadcast %cst_60 : f32 to vector<8x128xf32>
    %160 = arith.addf %158, %159 : vector<8x128xf32>
    %cst_61 = arith.constant 5.000000e-01 : f32
    %161 = vector.broadcast %cst_61 : f32 to vector<8x128xf32>
    %162 = arith.mulf %161, %160 : vector<8x128xf32>
    %163 = vector.extract_strided_slice %140 {offsets = [0, 256], sizes = [8, 128], strides = [1, 1]} : vector<8x384xf32> to vector<8x128xf32>
    %164 = vector.extract_strided_slice %142 {offsets = [0, 256], sizes = [8, 128], strides = [1, 1]} : vector<8x384xf32> to vector<8x128xf32>
    %165 = arith.addf %164, %16 : vector<8x128xf32>
    %166 = arith.mulf %152, %165 : vector<8x128xf32>
    %167 = arith.addf %163, %166 : vector<8x128xf32>
    %168 = math.tanh %167 : vector<8x128xf32>
    %cst_62 = arith.constant 1.000000e+00 : f32
    %169 = vector.broadcast %cst_62 : f32 to vector<8x128xf32>
    %170 = arith.subf %169, %162 : vector<8x128xf32>
    %171 = arith.mulf %170, %168 : vector<8x128xf32>
    %172 = arith.mulf %162, %133 : vector<8x128xf32>
    %173 = arith.addf %171, %172 : vector<8x128xf32>
    %174 = arith.index_cast %c3_i32 : i32 to index
    %c0_63 = arith.constant 0 : index
    %c0_64 = arith.constant 0 : index
    %175 = vector.load %arg7[%174, %c0_63, %c0_64] : memref<8x8x128xf32, #tpu.memory_space<vmem>>, vector<1x8x128xf32>
    %176 = vector.shape_cast %175 : vector<1x8x128xf32> to vector<8x128xf32>
    %177 = vector.shape_cast %173 : vector<8x128xf32> to vector<1x8x128xf32>
    tpu.vector_store %arg7[%174, %c0_63, %c0_64], %177 {strides = array<i32>} : memref<8x8x128xf32, #tpu.memory_space<vmem>>, vector<1x8x128xf32>,
    %c4_i32 = arith.constant 4 : i32
    %178 = arith.index_cast %c4_i32 : i32 to index
    %c0_65 = arith.constant 0 : index
    %c0_66 = arith.constant 0 : index
    %179 = vector.load %arg8[%178, %c0_65, %c0_66] : memref<8x8x384xf32, #tpu.memory_space<vmem>>, vector<1x8x384xf32>
    %180 = vector.shape_cast %179 : vector<1x8x384xf32> to vector<8x384xf32>
    %181 = arith.truncf %173 : vector<8x128xf32> to vector<8x128xbf16>
    %cst_67 = arith.constant dense<0.000000e+00> : vector<8x384xf32>
    %182 = tpu.matmul %181, %13, %cst_67 {dimension_numbers = #tpu.dot_dimension_numbers<[1], [0], [0], [1], [0, 0, 1, 1], [], []>} : vector<8x128xbf16>, vector<128x384xbf16>, vector<8x384xf32> -> vector<8x384xf32>
    %183 = vector.extract_strided_slice %180 {offsets = [0, 0], sizes = [8, 128], strides = [1, 1]} : vector<8x384xf32> to vector<8x128xf32>
    %184 = vector.extract_strided_slice %182 {offsets = [0, 0], sizes = [8, 128], strides = [1, 1]} : vector<8x384xf32> to vector<8x128xf32>
    %185 = arith.addf %183, %184 : vector<8x128xf32>
    %cst_68 = arith.constant 5.000000e-01 : f32
    %186 = vector.broadcast %cst_68 : f32 to vector<8x128xf32>
    %187 = arith.mulf %186, %185 : vector<8x128xf32>
    %188 = math.tanh %187 : vector<8x128xf32>
    %cst_69 = arith.constant 1.000000e+00 : f32
    %189 = vector.broadcast %cst_69 : f32 to vector<8x128xf32>
    %190 = arith.addf %188, %189 : vector<8x128xf32>
    %cst_70 = arith.constant 5.000000e-01 : f32
    %191 = vector.broadcast %cst_70 : f32 to vector<8x128xf32>
    %192 = arith.mulf %191, %190 : vector<8x128xf32>
    %193 = vector.extract_strided_slice %180 {offsets = [0, 128], sizes = [8, 128], strides = [1, 1]} : vector<8x384xf32> to vector<8x128xf32>
    %194 = vector.extract_strided_slice %182 {offsets = [0, 128], sizes = [8, 128], strides = [1, 1]} : vector<8x384xf32> to vector<8x128xf32>
    %195 = arith.addf %193, %194 : vector<8x128xf32>
    %cst_71 = arith.constant 5.000000e-01 : f32
    %196 = vector.broadcast %cst_71 : f32 to vector<8x128xf32>
    %197 = arith.mulf %196, %195 : vector<8x128xf32>
    %198 = math.tanh %197 : vector<8x128xf32>
    %cst_72 = arith.constant 1.000000e+00 : f32
    %199 = vector.broadcast %cst_72 : f32 to vector<8x128xf32>
    %200 = arith.addf %198, %199 : vector<8x128xf32>
    %cst_73 = arith.constant 5.000000e-01 : f32
    %201 = vector.broadcast %cst_73 : f32 to vector<8x128xf32>
    %202 = arith.mulf %201, %200 : vector<8x128xf32>
    %203 = vector.extract_strided_slice %180 {offsets = [0, 256], sizes = [8, 128], strides = [1, 1]} : vector<8x384xf32> to vector<8x128xf32>
    %204 = vector.extract_strided_slice %182 {offsets = [0, 256], sizes = [8, 128], strides = [1, 1]} : vector<8x384xf32> to vector<8x128xf32>
    %205 = arith.addf %204, %16 : vector<8x128xf32>
    %206 = arith.mulf %192, %205 : vector<8x128xf32>
    %207 = arith.addf %203, %206 : vector<8x128xf32>
    %208 = math.tanh %207 : vector<8x128xf32>
    %cst_74 = arith.constant 1.000000e+00 : f32
    %209 = vector.broadcast %cst_74 : f32 to vector<8x128xf32>
    %210 = arith.subf %209, %202 : vector<8x128xf32>
    %211 = arith.mulf %210, %208 : vector<8x128xf32>
    %212 = arith.mulf %202, %173 : vector<8x128xf32>
    %213 = arith.addf %211, %212 : vector<8x128xf32>
    %214 = arith.index_cast %c4_i32 : i32 to index
    %c0_75 = arith.constant 0 : index
    %c0_76 = arith.constant 0 : index
    %215 = vector.load %arg7[%214, %c0_75, %c0_76] : memref<8x8x128xf32, #tpu.memory_space<vmem>>, vector<1x8x128xf32>
    %216 = vector.shape_cast %215 : vector<1x8x128xf32> to vector<8x128xf32>
    %217 = vector.shape_cast %213 : vector<8x128xf32> to vector<1x8x128xf32>
    tpu.vector_store %arg7[%214, %c0_75, %c0_76], %217 {strides = array<i32>} : memref<8x8x128xf32, #tpu.memory_space<vmem>>, vector<1x8x128xf32>,
    %c5_i32 = arith.constant 5 : i32
    %218 = arith.index_cast %c5_i32 : i32 to index
    %c0_77 = arith.constant 0 : index
    %c0_78 = arith.constant 0 : index
    %219 = vector.load %arg8[%218, %c0_77, %c0_78] : memref<8x8x384xf32, #tpu.memory_space<vmem>>, vector<1x8x384xf32>
    %220 = vector.shape_cast %219 : vector<1x8x384xf32> to vector<8x384xf32>
    %221 = arith.truncf %213 : vector<8x128xf32> to vector<8x128xbf16>
    %cst_79 = arith.constant dense<0.000000e+00> : vector<8x384xf32>
    %222 = tpu.matmul %221, %13, %cst_79 {dimension_numbers = #tpu.dot_dimension_numbers<[1], [0], [0], [1], [0, 0, 1, 1], [], []>} : vector<8x128xbf16>, vector<128x384xbf16>, vector<8x384xf32> -> vector<8x384xf32>
    %223 = vector.extract_strided_slice %220 {offsets = [0, 0], sizes = [8, 128], strides = [1, 1]} : vector<8x384xf32> to vector<8x128xf32>
    %224 = vector.extract_strided_slice %222 {offsets = [0, 0], sizes = [8, 128], strides = [1, 1]} : vector<8x384xf32> to vector<8x128xf32>
    %225 = arith.addf %223, %224 : vector<8x128xf32>
    %cst_80 = arith.constant 5.000000e-01 : f32
    %226 = vector.broadcast %cst_80 : f32 to vector<8x128xf32>
    %227 = arith.mulf %226, %225 : vector<8x128xf32>
    %228 = math.tanh %227 : vector<8x128xf32>
    %cst_81 = arith.constant 1.000000e+00 : f32
    %229 = vector.broadcast %cst_81 : f32 to vector<8x128xf32>
    %230 = arith.addf %228, %229 : vector<8x128xf32>
    %cst_82 = arith.constant 5.000000e-01 : f32
    %231 = vector.broadcast %cst_82 : f32 to vector<8x128xf32>
    %232 = arith.mulf %231, %230 : vector<8x128xf32>
    %233 = vector.extract_strided_slice %220 {offsets = [0, 128], sizes = [8, 128], strides = [1, 1]} : vector<8x384xf32> to vector<8x128xf32>
    %234 = vector.extract_strided_slice %222 {offsets = [0, 128], sizes = [8, 128], strides = [1, 1]} : vector<8x384xf32> to vector<8x128xf32>
    %235 = arith.addf %233, %234 : vector<8x128xf32>
    %cst_83 = arith.constant 5.000000e-01 : f32
    %236 = vector.broadcast %cst_83 : f32 to vector<8x128xf32>
    %237 = arith.mulf %236, %235 : vector<8x128xf32>
    %238 = math.tanh %237 : vector<8x128xf32>
    %cst_84 = arith.constant 1.000000e+00 : f32
    %239 = vector.broadcast %cst_84 : f32 to vector<8x128xf32>
    %240 = arith.addf %238, %239 : vector<8x128xf32>
    %cst_85 = arith.constant 5.000000e-01 : f32
    %241 = vector.broadcast %cst_85 : f32 to vector<8x128xf32>
    %242 = arith.mulf %241, %240 : vector<8x128xf32>
    %243 = vector.extract_strided_slice %220 {offsets = [0, 256], sizes = [8, 128], strides = [1, 1]} : vector<8x384xf32> to vector<8x128xf32>
    %244 = vector.extract_strided_slice %222 {offsets = [0, 256], sizes = [8, 128], strides = [1, 1]} : vector<8x384xf32> to vector<8x128xf32>
    %245 = arith.addf %244, %16 : vector<8x128xf32>
    %246 = arith.mulf %232, %245 : vector<8x128xf32>
    %247 = arith.addf %243, %246 : vector<8x128xf32>
    %248 = math.tanh %247 : vector<8x128xf32>
    %cst_86 = arith.constant 1.000000e+00 : f32
    %249 = vector.broadcast %cst_86 : f32 to vector<8x128xf32>
    %250 = arith.subf %249, %242 : vector<8x128xf32>
    %251 = arith.mulf %250, %248 : vector<8x128xf32>
    %252 = arith.mulf %242, %213 : vector<8x128xf32>
    %253 = arith.addf %251, %252 : vector<8x128xf32>
    %254 = arith.index_cast %c5_i32 : i32 to index
    %c0_87 = arith.constant 0 : index
    %c0_88 = arith.constant 0 : index
    %255 = vector.load %arg7[%254, %c0_87, %c0_88] : memref<8x8x128xf32, #tpu.memory_space<vmem>>, vector<1x8x128xf32>
    %256 = vector.shape_cast %255 : vector<1x8x128xf32> to vector<8x128xf32>
    %257 = vector.shape_cast %253 : vector<8x128xf32> to vector<1x8x128xf32>
    tpu.vector_store %arg7[%254, %c0_87, %c0_88], %257 {strides = array<i32>} : memref<8x8x128xf32, #tpu.memory_space<vmem>>, vector<1x8x128xf32>,
    %c6_i32 = arith.constant 6 : i32
    %258 = arith.index_cast %c6_i32 : i32 to index
    %c0_89 = arith.constant 0 : index
    %c0_90 = arith.constant 0 : index
    %259 = vector.load %arg8[%258, %c0_89, %c0_90] : memref<8x8x384xf32, #tpu.memory_space<vmem>>, vector<1x8x384xf32>
    %260 = vector.shape_cast %259 : vector<1x8x384xf32> to vector<8x384xf32>
    %261 = arith.truncf %253 : vector<8x128xf32> to vector<8x128xbf16>
    %cst_91 = arith.constant dense<0.000000e+00> : vector<8x384xf32>
    %262 = tpu.matmul %261, %13, %cst_91 {dimension_numbers = #tpu.dot_dimension_numbers<[1], [0], [0], [1], [0, 0, 1, 1], [], []>} : vector<8x128xbf16>, vector<128x384xbf16>, vector<8x384xf32> -> vector<8x384xf32>
    %263 = vector.extract_strided_slice %260 {offsets = [0, 0], sizes = [8, 128], strides = [1, 1]} : vector<8x384xf32> to vector<8x128xf32>
    %264 = vector.extract_strided_slice %262 {offsets = [0, 0], sizes = [8, 128], strides = [1, 1]} : vector<8x384xf32> to vector<8x128xf32>
    %265 = arith.addf %263, %264 : vector<8x128xf32>
    %cst_92 = arith.constant 5.000000e-01 : f32
    %266 = vector.broadcast %cst_92 : f32 to vector<8x128xf32>
    %267 = arith.mulf %266, %265 : vector<8x128xf32>
    %268 = math.tanh %267 : vector<8x128xf32>
    %cst_93 = arith.constant 1.000000e+00 : f32
    %269 = vector.broadcast %cst_93 : f32 to vector<8x128xf32>
    %270 = arith.addf %268, %269 : vector<8x128xf32>
    %cst_94 = arith.constant 5.000000e-01 : f32
    %271 = vector.broadcast %cst_94 : f32 to vector<8x128xf32>
    %272 = arith.mulf %271, %270 : vector<8x128xf32>
    %273 = vector.extract_strided_slice %260 {offsets = [0, 128], sizes = [8, 128], strides = [1, 1]} : vector<8x384xf32> to vector<8x128xf32>
    %274 = vector.extract_strided_slice %262 {offsets = [0, 128], sizes = [8, 128], strides = [1, 1]} : vector<8x384xf32> to vector<8x128xf32>
    %275 = arith.addf %273, %274 : vector<8x128xf32>
    %cst_95 = arith.constant 5.000000e-01 : f32
    %276 = vector.broadcast %cst_95 : f32 to vector<8x128xf32>
    %277 = arith.mulf %276, %275 : vector<8x128xf32>
    %278 = math.tanh %277 : vector<8x128xf32>
    %cst_96 = arith.constant 1.000000e+00 : f32
    %279 = vector.broadcast %cst_96 : f32 to vector<8x128xf32>
    %280 = arith.addf %278, %279 : vector<8x128xf32>
    %cst_97 = arith.constant 5.000000e-01 : f32
    %281 = vector.broadcast %cst_97 : f32 to vector<8x128xf32>
    %282 = arith.mulf %281, %280 : vector<8x128xf32>
    %283 = vector.extract_strided_slice %260 {offsets = [0, 256], sizes = [8, 128], strides = [1, 1]} : vector<8x384xf32> to vector<8x128xf32>
    %284 = vector.extract_strided_slice %262 {offsets = [0, 256], sizes = [8, 128], strides = [1, 1]} : vector<8x384xf32> to vector<8x128xf32>
    %285 = arith.addf %284, %16 : vector<8x128xf32>
    %286 = arith.mulf %272, %285 : vector<8x128xf32>
    %287 = arith.addf %283, %286 : vector<8x128xf32>
    %288 = math.tanh %287 : vector<8x128xf32>
    %cst_98 = arith.constant 1.000000e+00 : f32
    %289 = vector.broadcast %cst_98 : f32 to vector<8x128xf32>
    %290 = arith.subf %289, %282 : vector<8x128xf32>
    %291 = arith.mulf %290, %288 : vector<8x128xf32>
    %292 = arith.mulf %282, %253 : vector<8x128xf32>
    %293 = arith.addf %291, %292 : vector<8x128xf32>
    %294 = arith.index_cast %c6_i32 : i32 to index
    %c0_99 = arith.constant 0 : index
    %c0_100 = arith.constant 0 : index
    %295 = vector.load %arg7[%294, %c0_99, %c0_100] : memref<8x8x128xf32, #tpu.memory_space<vmem>>, vector<1x8x128xf32>
    %296 = vector.shape_cast %295 : vector<1x8x128xf32> to vector<8x128xf32>
    %297 = vector.shape_cast %293 : vector<8x128xf32> to vector<1x8x128xf32>
    tpu.vector_store %arg7[%294, %c0_99, %c0_100], %297 {strides = array<i32>} : memref<8x8x128xf32, #tpu.memory_space<vmem>>, vector<1x8x128xf32>,
    %c7_i32 = arith.constant 7 : i32
    %298 = arith.index_cast %c7_i32 : i32 to index
    %c0_101 = arith.constant 0 : index
    %c0_102 = arith.constant 0 : index
    %299 = vector.load %arg8[%298, %c0_101, %c0_102] : memref<8x8x384xf32, #tpu.memory_space<vmem>>, vector<1x8x384xf32>
    %300 = vector.shape_cast %299 : vector<1x8x384xf32> to vector<8x384xf32>
    %301 = arith.truncf %293 : vector<8x128xf32> to vector<8x128xbf16>
    %cst_103 = arith.constant dense<0.000000e+00> : vector<8x384xf32>
    %302 = tpu.matmul %301, %13, %cst_103 {dimension_numbers = #tpu.dot_dimension_numbers<[1], [0], [0], [1], [0, 0, 1, 1], [], []>} : vector<8x128xbf16>, vector<128x384xbf16>, vector<8x384xf32> -> vector<8x384xf32>
    %303 = vector.extract_strided_slice %300 {offsets = [0, 0], sizes = [8, 128], strides = [1, 1]} : vector<8x384xf32> to vector<8x128xf32>
    %304 = vector.extract_strided_slice %302 {offsets = [0, 0], sizes = [8, 128], strides = [1, 1]} : vector<8x384xf32> to vector<8x128xf32>
    %305 = arith.addf %303, %304 : vector<8x128xf32>
    %cst_104 = arith.constant 5.000000e-01 : f32
    %306 = vector.broadcast %cst_104 : f32 to vector<8x128xf32>
    %307 = arith.mulf %306, %305 : vector<8x128xf32>
    %308 = math.tanh %307 : vector<8x128xf32>
    %cst_105 = arith.constant 1.000000e+00 : f32
    %309 = vector.broadcast %cst_105 : f32 to vector<8x128xf32>
    %310 = arith.addf %308, %309 : vector<8x128xf32>
    %cst_106 = arith.constant 5.000000e-01 : f32
    %311 = vector.broadcast %cst_106 : f32 to vector<8x128xf32>
    %312 = arith.mulf %311, %310 : vector<8x128xf32>
    %313 = vector.extract_strided_slice %300 {offsets = [0, 128], sizes = [8, 128], strides = [1, 1]} : vector<8x384xf32> to vector<8x128xf32>
    %314 = vector.extract_strided_slice %302 {offsets = [0, 128], sizes = [8, 128], strides = [1, 1]} : vector<8x384xf32> to vector<8x128xf32>
    %315 = arith.addf %313, %314 : vector<8x128xf32>
    %cst_107 = arith.constant 5.000000e-01 : f32
    %316 = vector.broadcast %cst_107 : f32 to vector<8x128xf32>
    %317 = arith.mulf %316, %315 : vector<8x128xf32>
    %318 = math.tanh %317 : vector<8x128xf32>
    %cst_108 = arith.constant 1.000000e+00 : f32
    %319 = vector.broadcast %cst_108 : f32 to vector<8x128xf32>
    %320 = arith.addf %318, %319 : vector<8x128xf32>
    %cst_109 = arith.constant 5.000000e-01 : f32
    %321 = vector.broadcast %cst_109 : f32 to vector<8x128xf32>
    %322 = arith.mulf %321, %320 : vector<8x128xf32>
    %323 = vector.extract_strided_slice %300 {offsets = [0, 256], sizes = [8, 128], strides = [1, 1]} : vector<8x384xf32> to vector<8x128xf32>
    %324 = vector.extract_strided_slice %302 {offsets = [0, 256], sizes = [8, 128], strides = [1, 1]} : vector<8x384xf32> to vector<8x128xf32>
    %325 = arith.addf %324, %16 : vector<8x128xf32>
    %326 = arith.mulf %312, %325 : vector<8x128xf32>
    %327 = arith.addf %323, %326 : vector<8x128xf32>
    %328 = math.tanh %327 : vector<8x128xf32>
    %cst_110 = arith.constant 1.000000e+00 : f32
    %329 = vector.broadcast %cst_110 : f32 to vector<8x128xf32>
    %330 = arith.subf %329, %322 : vector<8x128xf32>
    %331 = arith.mulf %330, %328 : vector<8x128xf32>
    %332 = arith.mulf %322, %293 : vector<8x128xf32>
    %333 = arith.addf %331, %332 : vector<8x128xf32>
    %334 = arith.index_cast %c7_i32 : i32 to index
    %c0_111 = arith.constant 0 : index
    %c0_112 = arith.constant 0 : index
    %335 = vector.load %arg7[%334, %c0_111, %c0_112] : memref<8x8x128xf32, #tpu.memory_space<vmem>>, vector<1x8x128xf32>
    %336 = vector.shape_cast %335 : vector<1x8x128xf32> to vector<8x128xf32>
    %337 = vector.shape_cast %333 : vector<8x128xf32> to vector<1x8x128xf32>
    tpu.vector_store %arg7[%334, %c0_111, %c0_112], %337 {strides = array<i32>} : memref<8x8x128xf32, #tpu.memory_space<vmem>>, vector<1x8x128xf32>,
    %c8_i32 = arith.constant 8 : i32
    %c0_113 = arith.constant 0 : index
    %c0_114 = arith.constant 0 : index
    %338 = vector.load %arg9[%c0_113, %c0_114] : memref<8x128xf32, #tpu.memory_space<vmem>>, vector<8x128xf32>
    tpu.vector_store %arg9[%c0_113, %c0_114], %333 {strides = array<i32>} : memref<8x128xf32, #tpu.memory_space<vmem>>, vector<8x128xf32>,
    return
  }
  func.func @transform_0(%arg0: i32, %arg1: i32) -> (i32, i32, i32) {
    %c0_i32 = arith.constant 0 : i32
    %c0_i32_0 = arith.constant 0 : i32
    return %arg1, %arg0, %c0_i32 : i32, i32, i32
  }
  func.func @transform_1(%arg0: i32, %arg1: i32) -> (i32, i32) {
    %c0_i32 = arith.constant 0 : i32
    %c0_i32_0 = arith.constant 0 : i32
    %c0_i32_1 = arith.constant 0 : i32
    return %c0_i32, %c0_i32_0 : i32, i32
  }
  func.func @transform_2(%arg0: i32, %arg1: i32) -> (i32, i32) {
    %c0_i32 = arith.constant 0 : i32
    %c0_i32_0 = arith.constant 0 : i32
    %c0_i32_1 = arith.constant 0 : i32
    return %c0_i32, %c0_i32_0 : i32, i32
  }
  func.func @transform_3(%arg0: i32, %arg1: i32) -> (i32, i32) {
    %c0_i32 = arith.constant 0 : i32
    %c0_i32_0 = arith.constant 0 : i32
    %c0_i32_1 = arith.constant 0 : i32
    return %c0_i32, %c0_i32_0 : i32, i32
  }
  func.func @transform_4(%arg0: i32, %arg1: i32) -> (i32, i32) {
    %c0_i32 = arith.constant 0 : i32
    %c0_i32_0 = arith.constant 0 : i32
    %c0_i32_1 = arith.constant 0 : i32
    return %c0_i32, %c0_i32_0 : i32, i32
  }
  func.func @transform_5(%arg0: i32, %arg1: i32) -> (i32, i32, i32) {
    %c0_i32 = arith.constant 0 : i32
    %c0_i32_0 = arith.constant 0 : i32
    return %arg1, %arg0, %c0_i32 : i32, i32, i32
  }
}

</mosaic_0001>

<bundles_post_ra>
// kernel: vanilla_gru_forward.1
= control target key start
LH: loop header
LB: loop body
LE: loop exit
PB: predicated region body
PF: predicated region fallthrough
CT: control target
= control target key end

     0   :  { %v2582_v1 = vmov 0   ;;  %v2584_v39 = vmov 0.0   ;;  %vm1857_vm0 = vmmov 0   ;;  %v1858_v62 = vmov 0.0|0.0   ;;  %s2576_s1 = inlined_call_operand.vmem [shape: bf16[128,384], index: 1, kind: input, shape index: {}]   ;;  %s2577_s0 = inlined_call_operand.vmem [shape: f32[8,8,128], index: 0, kind: input, shape index: {}]   ;;  %s2578_s2 = inlined_call_operand.vmem [shape: bf16[128,384], index: 2, kind: input, shape index: {}]   ;;  %s2579_s3 = inlined_call_operand.vmem [shape: f32[1,384], index: 3, kind: input, shape index: {}]   ;;  %s2580_s4 = inlined_call_operand.vmem [shape: f32[1,128], index: 4, kind: input, shape index: {}]   ;;  %s2581_s5 = inlined_call_operand.vmem [shape: f32[8,8,128], index: 5, kind: output, shape index: {}]  }
   0x1   :  { %v1724_v0 = vld [vmem:[%s2576_s1 + $0x4] ss:$12 sps:$4 sm:$0xff]   ;;  %247 = vmatprep.mubr.bf16.mxu0 %v2582_v1  ;;  %v1726_v2 = vld [vmem:[%s2576_s1] ss:$12 sps:$4 sm:$0xff]   ;;  %v1727_v3 = vld [vmem:[%s2576_s1 + $0x1c] ss:$12 sps:$4 sm:$0xff]   ;;  %v72_v63 = vlaneseq }
   0x2   :  { %215 = vmatprep.subr.bf16.mxu0 %v1724_v0  ;;  %v1729_v4 = vld [vmem:[%s2576_s1 + $0x18] ss:$12 sps:$4 sm:$0xff]   ;;  %v1730_v5 = vld [vmem:[%s2576_s1 + $0x34] ss:$12 sps:$4 sm:$0xff]   ;;  %v1732_v7 = vld [vmem:[%s2576_s1 + $0x30] ss:$12 sps:$4 sm:$0xff]  }
   0x3   :  { %216 = vmatpush1.bf16.msra.mxu0 %v1726_v2  ;;  %v1736_v6 = vld [vmem:[%s2576_s1 + $0x8] ss:$12 sps:$4 sm:$0xff]   ;;  %v1733_v8 = vld [vmem:[%s2576_s1 + $0x4c] ss:$12 sps:$4 sm:$0xff]   ;;  %v1737_v12 = vld [vmem:[%s2576_s1 + $0x64] ss:$12 sps:$4 sm:$0xff]  }
   0x4   :  { %217 = vmatprep.subr.bf16.mxu0 %v1727_v3  ;;  %1536 = vmatprep.subr.bf16.mxu1 %v1736_v6  ;;  %v1740_v9 = vld [vmem:[%s2576_s1 + $0x20] ss:$12 sps:$4 sm:$0xff]   ;;  %v1744_v10 = vld [vmem:[%s2576_s1 + $0x38] ss:$12 sps:$4 sm:$0xff]   ;;  %v1735_v11 = vld [vmem:[%s2576_s1 + $0x48] ss:$12 sps:$4 sm:$0xff]  }
   0x5   :  { %1537 = vmatpush3.bf16.msra.mxu1 %v1736_v6  ;;  %v1739_v13 = vld [vmem:[%s2576_s1 + $0x60] ss:$12 sps:$4 sm:$0xff]   ;;  %v1748_v14 = vld [vmem:[%s2576_s1 + $0x50] ss:$12 sps:$4 sm:$0xff]   ;;  %v1752_v19 = vld [vmem:[%s2576_s1 + $0x68] ss:$12 sps:$4 sm:$0xff]  }
   0x6   :  { %1538 = vmatprep.subr.bf16.mxu1 %v1740_v9  ;;  %v1741_v15 = vld [vmem:[%s2576_s1 + $0x7c] ss:$12 sps:$4 sm:$0xff]   ;;  %v26_v16 = vld [vmem:[%s2577_s0] sm:$0xff]  ;;  %v1749_v24 = vld [vmem:[%s2576_s1 + $0xac] ss:$12 sps:$4 sm:$0xff]   ;;  %v73_v0 = vshrl.u32 %v72_v63, 7 }
   0x7   :  { %218 = vmatpush1.bf16.msra.mxu0 %v1729_v4  ;;  %v27_v17 = vld [vmem:[%s2577_s0 + $0x8] sm:$0xff]  ;;  %v1743_v20 = vld [vmem:[%s2576_s1 + $0x78] ss:$12 sps:$4 sm:$0xff]   ;;  %v1745_v21 = vld [vmem:[%s2576_s1 + $0x94] ss:$12 sps:$4 sm:$0xff]  }
   0x8   :  { %219 = vmatprep.subr.bf16.mxu0 %v1730_v5  ;;  %v34_v18 = vpack.c.bf16 %v27_v17, %v26_v16  ;;  %v1756_v22 = vld [vmem:[%s2576_s1 + $0x80] ss:$12 sps:$4 sm:$0xff]   ;;  %v1747_v23 = vld [vmem:[%s2576_s1 + $0x90] ss:$12 sps:$4 sm:$0xff]   ;;  %v1760_v25 = vld [vmem:[%s2576_s1 + $0x98] ss:$12 sps:$4 sm:$0xff]  }
   0x9   :  { %1539 = vmatpush3.bf16.msra.mxu1 %v1740_v9  ;;  %v1751_v26 = vld [vmem:[%s2576_s1 + $0xa8] ss:$12 sps:$4 sm:$0xff]   ;;  %v1968_v27 = vld [vmem:[%s2578_s2 + $0x4] ss:$12 sps:$4 sm:$0xff]   ;;  %v1976_v29 = vld [vmem:[%s2578_s2] ss:$12 sps:$4 sm:$0xff]  }
   0xa   :  { %1540 = vmatprep.subr.bf16.mxu1 %v1744_v10  ;;  %1552 = vmatprep.mubr.bf16.mxu1 %v34_v18  ;;  %v1764_v28 = vld [vmem:[%s2576_s1 + $0xb0] ss:$12 sps:$4 sm:$0xff]   ;;  %v1987_v31 = vld [vmem:[%s2578_s2 + $0x18] ss:$12 sps:$4 sm:$0xff]   ;;  %v2000_v34 = vld [vmem:[%s2578_s2 + $0x34] ss:$12 sps:$4 sm:$0xff]  }
   0xb   :  { %220 = vmatpush1.bf16.msra.mxu0 %v1732_v7  ;;  %v1982_v30 = vld [vmem:[%s2578_s2 + $0x1c] ss:$12 sps:$4 sm:$0xff]   ;;  %v28_v32 = vld [vmem:[%s2577_s0 + $0x10] sm:$0xff]  ;;  %v30_v35 = vld [vmem:[%s2577_s0 + $0x20] sm:$0xff]  ;;  %v74_v2 = vsub.s32 0, %v73_v0  ;;  %v78_v4 = vsub.s32 1, %v73_v0 }
   0xc   :  { %221 = vmatprep.subr.bf16.mxu0 %v1733_v8  ;;  %v29_v33 = vld [vmem:[%s2577_s0 + $0x18] sm:$0xff]  ;;  %v31_v36 = vld [vmem:[%s2577_s0 + $0x28] sm:$0xff]  ;;  %v32_v45 = vld [vmem:[%s2577_s0 + $0x30] sm:$0xff]  ;;  %v82_v5 = vsub.s32 2, %v73_v0 }
   0xd   :  { %1541 = vmatpush3.bf16.msra.mxu1 %v1744_v10  ;;  %v2012_v37 = vld [vmem:[%s2578_s2 + $0x8] ss:$12 sps:$4 sm:$0xff]   ;;  %v35_v38 = vpack.c.bf16 %v29_v33, %v28_v32  ;;  %v2019_v40 = vld [vmem:[%s2578_s2 + $0x30] ss:$12 sps:$4 sm:$0xff]   ;;  %v36_v41 = vpack.c.bf16 %v31_v36, %v30_v35  ;;  %v2025_v42 = vld [vmem:[%s2578_s2 + $0x4c] ss:$12 sps:$4 sm:$0xff]  }
   0xe   :  { %1542 = vmatprep.subr.bf16.mxu1 %v1748_v14  ;;  %v2031_v43 = vld [vmem:[%s2578_s2 + $0x20] ss:$12 sps:$4 sm:$0xff]   ;;  %v2038_v44 = vld [vmem:[%s2578_s2 + $0x48] ss:$12 sps:$4 sm:$0xff]   ;;  %v33_v46 = vld [vmem:[%s2577_s0 + $0x38] sm:$0xff] }
   0xf   :  { %222 = vmatpush1.bf16.msra.mxu0 %v1735_v11  ;;  %v2051_v47 = vld [vmem:[%s2578_s2 + $0x64] ss:$12 sps:$4 sm:$0xff]   ;;  %v37_v49 = vpack.c.bf16 %v33_v46, %v32_v45  ;;  %v2064_v50 = vld [vmem:[%s2578_s2 + $0x60] ss:$12 sps:$4 sm:$0xff]   ;;  %v2070_v51 = vld [vmem:[%s2578_s2 + $0x7c] ss:$12 sps:$4 sm:$0xff]  }
  0x10   :  { %223 = vmatprep.subr.bf16.mxu0 %v1737_v12  ;;  %v2057_v48 = vld [vmem:[%s2578_s2 + $0x38] ss:$12 sps:$4 sm:$0xff]   ;;  %v2076_v52 = vld [vmem:[%s2578_s2 + $0x50] ss:$12 sps:$4 sm:$0xff]   ;;  %v2092_v54 = vld [vmem:[%s2578_s2 + $0x94] ss:$12 sps:$4 sm:$0xff]  }
  0x11   :  { %1543 = vmatpush3.bf16.msra.mxu1 %v1748_v14  ;;  %v2085_v53 = vld [vmem:[%s2578_s2 + $0x78] ss:$12 sps:$4 sm:$0xff]   ;;  %v2098_v55 = vld [vmem:[%s2578_s2 + $0x68] ss:$12 sps:$4 sm:$0xff]   ;;  %v2105_v56 = vld [vmem:[%s2578_s2 + $0x90] ss:$12 sps:$4 sm:$0xff]  }
  0x12   :  { %1544 = vmatprep.subr.bf16.mxu1 %v1752_v19  ;;  %v2111_v57 = vld [vmem:[%s2578_s2 + $0xac] ss:$12 sps:$4 sm:$0xff]   ;;  %v2124_v59 = vld [vmem:[%s2578_s2 + $0xa8] ss:$12 sps:$4 sm:$0xff]   ;;  %v2141_v61 = vld [vmem:[%s2578_s2 + $0xb0] ss:$12 sps:$4 sm:$0xff]  }
  0x13   :  { %224 = vmatpush1.bf16.msra.mxu0 %v1739_v13  ;;  %v2117_v58 = vld [vmem:[%s2578_s2 + $0x80] ss:$12 sps:$4 sm:$0xff]   ;;  %v2132_v60 = vld [vmem:[%s2578_s2 + $0x98] ss:$12 sps:$4 sm:$0xff]  }
  0x14   :  { %225 = vmatprep.subr.bf16.mxu0 %v1741_v15  ;;  %v70_v3 = vld [vmem:[%s2579_s3] sm:$0x7] }
  0x15   :  { %1545 = vmatpush3.bf16.msra.mxu1 %v1752_v19  ;;  %v75_v7 = vrot.slane %v70_v3, %v74_v2  ;;  %v79_v9 = vrot.slane %v70_v3, %v78_v4  ;;  %v2186_v13 = vrot.slane %v70_v3, %v82_v5 }
  0x16   :  { %1546 = vmatprep.subr.bf16.mxu1 %v1756_v22 }
  0x17   :  { %226 = vmatpush1.bf16.msra.mxu0 %v1743_v20 }
  0x18   :  { %227 = vmatprep.subr.bf16.mxu0 %v1745_v21 }
  0x19   :  { %1547 = vmatpush3.bf16.msra.mxu1 %v1756_v22 }
  0x1a   :  { %1548 = vmatprep.subr.bf16.mxu1 %v1760_v25 }
  0x1b   :  { %228 = vmatpush1.bf16.msra.mxu0 %v1747_v23 }
  0x1c   :  { %229 = vmatprep.subr.bf16.mxu0 %v1749_v24 }
  0x1d   :  { %1549 = vmatpush3.bf16.msra.mxu1 %v1760_v25 }
  0x1e   :  { %1550 = vmatprep.subr.bf16.mxu1 %v1764_v28 }
  0x1f   :  { %230 = vmatpush1.bf16.msra.mxu0 %v1751_v26 }
  0x20   :  { %549 = vmatprep.subr.bf16.mxu0 %v1968_v27 }
  0x21   :  { %1551 = vmatpush3.bf16.msra.mxu1 %v1764_v28 }
  0x22   :  { %248 = vmatmul.mubr.bf16.vlgmr.msra.gmra.mrb[0].mxu0 %v34_v18  ;;  %1560 = vmatprep.subr.bf16.mxu1 %v2584_v39 }
  0x23   :  { %550 = vmatpush1.bf16.msra.mxu0 %v1976_v29  ;;  %257 = vmatprep.mubr.bf16.mxu0 %v2582_v1 }
  0x24   :  { %551 = vmatprep.subr.bf16.mxu0 %v1982_v30  ;;  %1553 = vmatmul.mubr.bf16.vlgmr.msra.gmra.mrb[0].mxu1 %v35_v38 }
  0x25   :  { %1561 = vmatpush3.bf16.msra.mxu1 %v2012_v37  ;;  %1556 = vmatprep.mubr.bf16.mxu1 %v36_v41 }
  0x26   :  { %1562 = vmatprep.subr.bf16.mxu1 %v2584_v39 }
  0x27   :  { %552 = vmatpush1.bf16.msra.mxu0 %v1987_v31 }
  0x28   :  { %553 = vmatprep.subr.bf16.mxu0 %v2000_v34 }
  0x29   :  { %1563 = vmatpush3.bf16.msra.mxu1 %v2031_v43 }
  0x2a   :  { %258 = vmatmul.mubr.bf16.gmra.mrb[4].mxu0 %v35_v38  ;;  %1564 = vmatprep.subr.bf16.mxu1 %v2584_v39 }
  0x2b   :  { %554 = vmatpush1.bf16.msra.mxu0 %v2019_v40  ;;  %267 = vmatprep.mubr.bf16.mxu0 %v2582_v1 }
  0x2c   :  { %555 = vmatprep.subr.bf16.mxu0 %v2025_v42  ;;  %1557 = vmatmul.mubr.bf16.gmra.mrb[4].mxu1 %v37_v49 }
  0x2d   :  { %1565 = vmatpush3.bf16.msra.mxu1 %v2057_v48  ;;  %1576 = vmatprep.mubr.msk.bf16.mxu1 %vm1857_vm0, %v2584_v39 }
  0x2e   :  { %1566 = vmatprep.subr.bf16.mxu1 %v2584_v39 }
  0x2f   :  { %556 = vmatpush1.bf16.msra.mxu0 %v2038_v44 }
  0x30   :  { %557 = vmatprep.subr.bf16.mxu0 %v2051_v47 }
  0x31   :  { %1567 = vmatpush3.bf16.msra.mxu1 %v2076_v52 }
  0x32   :  { %268 = vmatmul.mubr.bf16.gmra.mrb[8].mxu0 %v36_v41  ;;  %1568 = vmatprep.subr.bf16.mxu1 %v2584_v39 }
  0x33   :  { %558 = vmatpush1.bf16.msra.mxu0 %v2064_v50  ;;  %277 = vmatprep.mubr.bf16.mxu0 %v2582_v1 }
  0x34   :  { %559 = vmatprep.subr.bf16.mxu0 %v2070_v51 }
  0x35   :  { %1569 = vmatpush3.bf16.msra.mxu1 %v2098_v55 }
  0x36   :  { %1570 = vmatprep.subr.bf16.mxu1 %v2584_v39 }
  0x37   :  { %560 = vmatpush1.bf16.msra.mxu0 %v2085_v53 }
  0x38   :  { %561 = vmatprep.subr.bf16.mxu0 %v2092_v54 }
  0x39   :  { %1571 = vmatpush3.bf16.msra.mxu1 %v2117_v58 }
  0x3a   :  { %278 = vmatmul.mubr.bf16.gmra.mrb[12].mxu0 %v37_v49  ;;  %1572 = vmatprep.subr.bf16.mxu1 %v2584_v39 }
  0x3b   :  { %562 = vmatpush1.bf16.msra.mxu0 %v2105_v56  ;;  %581 = vmatprep.mubr.bf16.mxu0 %v2582_v1 }
  0x3c   :  { %563 = vmatprep.subr.bf16.mxu0 %v2111_v57 }
  0x3d   :  { %1573 = vmatpush3.bf16.msra.mxu1 %v2132_v60 }
  0x3e   :  { %1574 = vmatprep.subr.bf16.mxu1 %v2584_v39 }
  0x3f   :  { %564 = vmatpush1.bf16.msra.mxu0 %v2124_v59 }
  0x40   :  { %654 = vmatprep.subr.bf16.mxu0 %v1968_v27 }
  0x41   :  { %1575 = vmatpush3.bf16.msra.mxu1 %v2141_v61 }
  0x42   :  { %582 = vmatmul.mubr.bf16.vlgmr.msra.gmra.mrb[16].mxu0 %v1858_v62  ;;  %1580 = vmatprep.subr.bf16.mxu1 %v2584_v39 }
  0x43   :  { %655 = vmatpush1.bf16.msra.mxu0 %v1976_v29  ;;  %686 = vmatprep.mubr.bf16.mxu0 %v2582_v1 }
  0x44   :  { %656 = vmatprep.subr.bf16.mxu0 %v1982_v30  ;;  %1577 = vmatmul.mubr.bf16.vlgmr.msra.gmra.mrb[8].mxu1 %v1858_v62 }
  0x45   :  { %1581 = vmatpush3.bf16.msra.mxu1 %v2012_v37  ;;  %1596 = vmatprep.mubr.msk.bf16.mxu1 %vm1857_vm0, %v2584_v39 }
  0x46   :  { %1582 = vmatprep.subr.bf16.mxu1 %v2584_v39 }
  0x47   :  { %657 = vmatpush1.bf16.msra.mxu0 %v1987_v31 }
  0x48   :  { %658 = vmatprep.subr.bf16.mxu0 %v2000_v34 }
  0x49   :  { %1583 = vmatpush3.bf16.msra.mxu1 %v2031_v43 }
  0x4a   :  { %1584 = vmatprep.subr.bf16.mxu1 %v2584_v39 }
  0x4b   :  { %659 = vmatpush1.bf16.msra.mxu0 %v2019_v40 }
  0x4c   :  { %660 = vmatprep.subr.bf16.mxu0 %v2025_v42 }
  0x4d   :  { %1585 = vmatpush3.bf16.msra.mxu1 %v2057_v48 }
  0x4e   :  { %1586 = vmatprep.subr.bf16.mxu1 %v2584_v39 }
  0x4f   :  { %661 = vmatpush1.bf16.msra.mxu0 %v2038_v44 }
  0x50   :  { %662 = vmatprep.subr.bf16.mxu0 %v2051_v47 }
  0x51   :  { %1587 = vmatpush3.bf16.msra.mxu1 %v2076_v52 }
  0x52   :  { %1588 = vmatprep.subr.bf16.mxu1 %v2584_v39 }
  0x53   :  { %663 = vmatpush1.bf16.msra.mxu0 %v2064_v50 }
  0x54   :  { %664 = vmatprep.subr.bf16.mxu0 %v2070_v51 }
  0x55   :  { %1589 = vmatpush3.bf16.msra.mxu1 %v2098_v55 }
  0x56   :  { %1590 = vmatprep.subr.bf16.mxu1 %v2584_v39 }
  0x57   :  { %665 = vmatpush1.bf16.msra.mxu0 %v2085_v53 }
  0x58   :  { %666 = vmatprep.subr.bf16.mxu0 %v2092_v54 }
  0x59   :  { %1591 = vmatpush3.bf16.msra.mxu1 %v2117_v58 }
  0x5a   :  { %1592 = vmatprep.subr.bf16.mxu1 %v2584_v39 }
  0x5b   :  { %667 = vmatpush1.bf16.msra.mxu0 %v2105_v56 }
  0x5c   :  { %668 = vmatprep.subr.bf16.mxu0 %v2111_v57 }
  0x5d   :  { %1593 = vmatpush3.bf16.msra.mxu1 %v2132_v60 }
  0x5e   :  { %1594 = vmatprep.subr.bf16.mxu1 %v2584_v39 }
  0x5f   :  { %669 = vmatpush1.bf16.msra.mxu0 %v2124_v59 }
  0x60   :  { %760 = vmatprep.subr.bf16.mxu0 %v1968_v27 }
  0x61   :  { %1595 = vmatpush3.bf16.msra.mxu1 %v2141_v61 }
  0x62   :  { %1600 = vmatprep.subr.bf16.mxu1 %v2584_v39 }
  0xf5   :  { %v249_v6 = vpop.f32.mrb[0].mxu0 }
  0xf6   :  { %v251_v8 = vpop.f32.mrb[1].mxu0 }
  0xf7   :  { %v253_v10 = vpop.f32.mrb[2].mxu0  ;;  %v1554_v15 = vpop.f32.mrb[0].mxu1 }
  0xf8   :  { %v2184_v11 = vadd.f32 %v253_v10, %v75_v7  ;;  %v255_v12 = vpop.f32.mrb[3].mxu0  ;;  %v2191_v16 = vadd.f32 %v1554_v15, %v2186_v13  ;;  %v322_v17 = vpop.f32.mrb[1].mxu1 }
  0xf9   :  { %v2188_v14 = vadd.f32 %v255_v12, %v79_v9  ;;  %v1555_v19 = vpop.f32.mrb[2].mxu1 }
  0xfa   :  { %v2196_v22 = vadd.f32 %v1555_v19, %v2186_v13  ;;  %v325_v23 = vpop.f32.mrb[3].mxu1 }
  0xfb   :  { %v2201_v26 = vadd.f32 %v325_v23, %v2186_v13 }
  0xfd   :  { %v259_v18 = vpop.f32.mrb[4].mxu0 }
  0xfe   :  { %v2193_v20 = vadd.f32 %v259_v18, %v75_v7  ;;  %v261_v21 = vpop.f32.mrb[5].mxu0 }
  0xff   :  { %v2198_v24 = vadd.f32 %v261_v21, %v79_v9  ;;  %v263_v25 = vpop.f32.mrb[6].mxu0  ;;  %v1558_v35 = vpop.f32.mrb[4].mxu1 }
 0x100   :  { %v2203_v28 = vadd.f32 %v263_v25, %v75_v7  ;;  %v265_v32 = vpop.f32.mrb[7].mxu0  ;;  %v2208_v36 = vadd.f32 %v1558_v35, %v2186_v13  ;;  %v338_v38 = vpop.f32.mrb[5].mxu1 }
 0x101   :  { %v2205_v33 = vadd.f32 %v265_v32, %v79_v9  ;;  %v2211_v45 = vadd.f32 %v338_v38, %v2186_v13  ;;  %v1559_v46 = vpop.f32.mrb[6].mxu1  ;;  %v250_v38 = vadd.f32 %v249_v6, %v75_v7 }
 0x102   :  { %2586 = vst [vmem:[#allocation4_spill] sm:$0xff] %v2208_v36  ;;  %v2216_v63 = vadd.f32 %v1559_v46, %v2186_v13  ;;  %v341_v0 = vpop.f32.mrb[7].mxu1 }
 0x103   :  { %v2221_v4 = vadd.f32 %v341_v0, %v2186_v13 }
 0x104   :  { %2587 = vst [vmem:[#allocation5_spill] sm:$0xff] %v2216_v63 }
 0x105   :  { %v269_v41 = vpop.f32.mrb[8].mxu0 }
 0x106   :  { %v2213_v49 = vadd.f32 %v269_v41, %v75_v7  ;;  %v271_v62 = vpop.f32.mrb[9].mxu0  ;;  %v252_v41 = vadd.f32 %v251_v8, %v79_v9 }
 0x107   :  { %v2218_v2 = vadd.f32 %v271_v62, %v79_v9  ;;  %v273_v3 = vpop.f32.mrb[10].mxu0 }
 0x108   :  { %v2223_v5 = vadd.f32 %v273_v3, %v75_v7  ;;  %v275_v10 = vpop.f32.mrb[11].mxu0 }
 0x109   :  { %v2225_v12 = vadd.f32 %v275_v10, %v79_v9 }
 0x10d   :  { %v279_v15 = vpop.f32.mrb[12].mxu0 }
 0x10e   :  { %v2227_v18 = vadd.f32 %v279_v15, %v75_v7  ;;  %v281_v19 = vpop.f32.mrb[13].mxu0 }
 0x10f   :  { %v2229_v21 = vadd.f32 %v281_v19, %v79_v9  ;;  %v283_v23 = vpop.f32.mrb[14].mxu0 }
 0x110   :  { %v2231_v25 = vadd.f32 %v283_v23, %v75_v7  ;;  %v285_v32 = vpop.f32.mrb[15].mxu0  ;;  %v2238_v23 = vld [vmem:[%s2580_s4] ss:$0 sm:$0xff] }
 0x111   :  { %2588 = vst [vmem:[#allocation6_spill] sm:$0xff] %v2229_v21  ;;  %v2233_v35 = vadd.f32 %v285_v32, %v79_v9  ;;  %v323_v32 = vadd.f32 %v322_v17, %v2186_v13  ;;  %v2589_v17 = vmov 0.0  }
 0x115   :  { %v583_v46 = vpop.f32.mrb[16].mxu0 }
 0x116   :  { %v630_v62 = vadd.f32 %v583_v46, %v250_v38  ;;  %v585_v0 = vpop.f32.mrb[17].mxu0 }
 0x117   :  { %v635_v3 = vadd.f32 %v585_v0, %v252_v41  ;;  %v587_v10 = vpop.f32.mrb[18].mxu0  ;;  %v624_v15 = vpop.f32.mrb[8].mxu1 }
 0x118   :  { %v631_v1 = vmul.f32 0.5, %v630_v62  ;;  %v588_v39 = vpop.f32.mrb[19].mxu0  ;;  %v1578_v63 = vpop.f32.mrb[9].mxu1  ;;  %v640_v8 = vadd.f32 %v2238_v23, %v624_v15 }
 0x119   :  { %v636_v19 = vmul.f32 0.5, %v635_v3  ;;  %v627_v36 = vpop.f32.mrb[10].mxu1  ;;  %v2590_v3 = vmov 0  }
 0x11a   :  { %1788 = vtanh.f32 %v631_v1  ;;  %v1579_v21 = vpop.f32.mrb[11].mxu1 }
 0x11b   :  { %1790 = vtanh.f32 %v636_v19 }
 0x124   :  { %v1789_v6 = vpop.eup %1788 }
 0x125   :  { %v633_v7 = vadd.f32 1.0, %v1789_v6  ;;  %v1791_v1 = vpop.eup %1790 }
 0x126   :  { %v638_v63 = vadd.f32 1.0, %v1791_v1 }
 0x127   :  { %v634_v9 = vmul.f32 0.5, %v633_v7 }
 0x128   :  { %v639_v36 = vmul.f32 0.5, %v638_v63 }
 0x129   :  { %v641_v39 = vmul.f32 %v640_v8, %v634_v9 }
 0x12a   :  { %v644_v21 = vsub.f32 1.0, %v639_v36  ;;  %v646_v46 = vmul.f32 0.0, %v639_v36 }
 0x12b   :  { %v642_v38 = vadd.f32 %v641_v39, %v323_v32 }
 0x12d   :  { %1792 = vtanh.f32 %v642_v38 }
 0x137   :  { %v1793_v41 = vpop.eup %1792 }
 0x138   :  { %v645_v62 = vmul.f32 %v1793_v41, %v644_v21 }
 0x13a   :  { %v2242_v0 = vadd.f32 %v646_v46, %v645_v62 }
 0x13c   :  { %648 = vst [vmem:[%s2581_s5] sm:$0xff] %v2242_v0  ;;  %v653_v13 = vpack.c.bf16 %v2242_v0, %v2242_v0 }
 0x13e   :  { %687 = vmatmul.mubr.bf16.vlgmr.msra.gmra.mrb[20].mxu0 %v653_v13  ;;  %1597 = vmatmul.mubr.bf16.vlgmr.msra.gmra.mrb[12].mxu1 %v653_v13 }
 0x13f   :  { %761 = vmatpush1.bf16.msra.mxu0 %v1976_v29  ;;  %1601 = vmatpush3.bf16.msra.mxu1 %v2012_v37 }
 0x140   :  { %762 = vmatprep.subr.bf16.mxu0 %v1982_v30  ;;  %1602 = vmatprep.subr.bf16.mxu1 %v2589_v17 }
 0x141   :  { %792 = vmatprep.mubr.bf16.mxu0 %v2590_v3  ;;  %1616 = vmatprep.mubr.msk.bf16.mxu1 %vm1857_vm0, %v2589_v17 }
 0x143   :  { %763 = vmatpush1.bf16.msra.mxu0 %v1987_v31  ;;  %1603 = vmatpush3.bf16.msra.mxu1 %v2031_v43 }
 0x144   :  { %764 = vmatprep.subr.bf16.mxu0 %v2000_v34  ;;  %1604 = vmatprep.subr.bf16.mxu1 %v2589_v17 }
 0x147   :  { %765 = vmatpush1.bf16.msra.mxu0 %v2019_v40  ;;  %1605 = vmatpush3.bf16.msra.mxu1 %v2057_v48 }
 0x148   :  { %766 = vmatprep.subr.bf16.mxu0 %v2025_v42  ;;  %1606 = vmatprep.subr.bf16.mxu1 %v2589_v17 }
 0x14b   :  { %767 = vmatpush1.bf16.msra.mxu0 %v2038_v44  ;;  %1607 = vmatpush3.bf16.msra.mxu1 %v2076_v52 }
 0x14c   :  { %768 = vmatprep.subr.bf16.mxu0 %v2051_v47  ;;  %1608 = vmatprep.subr.bf16.mxu1 %v2589_v17 }
 0x14f   :  { %769 = vmatpush1.bf16.msra.mxu0 %v2064_v50  ;;  %1609 = vmatpush3.bf16.msra.mxu1 %v2098_v55 }
 0x150   :  { %770 = vmatprep.subr.bf16.mxu0 %v2070_v51  ;;  %1610 = vmatprep.subr.bf16.mxu1 %v2589_v17 }
 0x153   :  { %771 = vmatpush1.bf16.msra.mxu0 %v2085_v53  ;;  %1611 = vmatpush3.bf16.msra.mxu1 %v2117_v58 }
 0x154   :  { %772 = vmatprep.subr.bf16.mxu0 %v2092_v54  ;;  %1612 = vmatprep.subr.bf16.mxu1 %v2589_v17 }
 0x157   :  { %773 = vmatpush1.bf16.msra.mxu0 %v2105_v56  ;;  %1613 = vmatpush3.bf16.msra.mxu1 %v2132_v60 }
 0x158   :  { %774 = vmatprep.subr.bf16.mxu0 %v2111_v57  ;;  %1614 = vmatprep.subr.bf16.mxu1 %v2589_v17 }
 0x15b   :  { %775 = vmatpush1.bf16.msra.mxu0 %v2124_v59  ;;  %1615 = vmatpush3.bf16.msra.mxu1 %v2141_v61 }
 0x15c   :  { %866 = vmatprep.subr.bf16.mxu0 %v1968_v27  ;;  %1620 = vmatprep.subr.bf16.mxu1 %v2589_v17 }
 0x211   :  { %v688_v10 = vpop.f32.mrb[20].mxu0  ;;  %v729_v15 = vpop.f32.mrb[12].mxu1 }
 0x212   :  { %v735_v19 = vadd.f32 %v688_v10, %v2184_v11  ;;  %v690_v6 = vpop.f32.mrb[21].mxu0  ;;  %v1598_v7 = vpop.f32.mrb[13].mxu1  ;;  %v745_v46 = vadd.f32 %v2238_v23, %v729_v15 }
 0x213   :  { %v740_v8 = vadd.f32 %v690_v6, %v2188_v14  ;;  %v692_v9 = vpop.f32.mrb[22].mxu0  ;;  %v732_v32 = vpop.f32.mrb[14].mxu1 }
 0x214   :  { %v736_v39 = vmul.f32 0.5, %v735_v19  ;;  %v693_v1 = vpop.f32.mrb[23].mxu0  ;;  %v1599_v38 = vpop.f32.mrb[15].mxu1 }
 0x215   :  { %v741_v63 = vmul.f32 0.5, %v740_v8 }
 0x216   :  { %1794 = vtanh.f32 %v736_v39 }
 0x217   :  { %1796 = vtanh.f32 %v741_v63 }
 0x220   :  { %v1795_v36 = vpop.eup %1794 }
 0x221   :  { %v738_v21 = vadd.f32 1.0, %v1795_v36  ;;  %v1797_v13 = vpop.eup %1796 }
 0x222   :  { %v743_v10 = vadd.f32 1.0, %v1797_v13 }
 0x223   :  { %v739_v41 = vmul.f32 0.5, %v738_v21 }
 0x224   :  { %v744_v14 = vmul.f32 0.5, %v743_v10 }
 0x225   :  { %v746_v62 = vmul.f32 %v745_v46, %v739_v41 }
 0x226   :  { %v749_v6 = vsub.f32 1.0, %v744_v14  ;;  %v751_v9 = vmul.f32 %v744_v14, %v2242_v0 }
 0x227   :  { %v747_v11 = vadd.f32 %v746_v62, %v2201_v26 }
 0x229   :  { %1798 = vtanh.f32 %v747_v11 }
 0x233   :  { %v1799_v7 = vpop.eup %1798 }
 0x234   :  { %v750_v19 = vmul.f32 %v1799_v7, %v749_v6 }
 0x236   :  { %v2290_v32 = vadd.f32 %v751_v9, %v750_v19 }
 0x238   :  { %1445 = vst [vmem:[%s2581_s5 + $0x8] sm:$0xff] %v2290_v32  ;;  %v759_v15 = vpack.c.bf16 %v2290_v32, %v2290_v32 }
 0x23a   :  { %793 = vmatmul.mubr.bf16.vlgmr.msra.gmra.mrb[24].mxu0 %v759_v15  ;;  %1617 = vmatmul.mubr.bf16.vlgmr.msra.gmra.mrb[16].mxu1 %v759_v15 }
 0x23b   :  { %867 = vmatpush1.bf16.msra.mxu0 %v1976_v29  ;;  %1621 = vmatpush3.bf16.msra.mxu1 %v2012_v37 }
 0x23c   :  { %868 = vmatprep.subr.bf16.mxu0 %v1982_v30  ;;  %1622 = vmatprep.subr.bf16.mxu1 %v2589_v17 }
 0x23d   :  { %898 = vmatprep.mubr.bf16.mxu0 %v2590_v3  ;;  %1636 = vmatprep.mubr.msk.bf16.mxu1 %vm1857_vm0, %v2589_v17 }
 0x23f   :  { %869 = vmatpush1.bf16.msra.mxu0 %v1987_v31  ;;  %1623 = vmatpush3.bf16.msra.mxu1 %v2031_v43 }
 0x240   :  { %870 = vmatprep.subr.bf16.mxu0 %v2000_v34  ;;  %1624 = vmatprep.subr.bf16.mxu1 %v2589_v17 }
 0x243   :  { %871 = vmatpush1.bf16.msra.mxu0 %v2019_v40  ;;  %1625 = vmatpush3.bf16.msra.mxu1 %v2057_v48 }
 0x244   :  { %872 = vmatprep.subr.bf16.mxu0 %v2025_v42  ;;  %1626 = vmatprep.subr.bf16.mxu1 %v2589_v17 }
 0x247   :  { %873 = vmatpush1.bf16.msra.mxu0 %v2038_v44  ;;  %1627 = vmatpush3.bf16.msra.mxu1 %v2076_v52 }
 0x248   :  { %874 = vmatprep.subr.bf16.mxu0 %v2051_v47  ;;  %1628 = vmatprep.subr.bf16.mxu1 %v2589_v17 }
 0x24b   :  { %875 = vmatpush1.bf16.msra.mxu0 %v2064_v50  ;;  %1629 = vmatpush3.bf16.msra.mxu1 %v2098_v55 }
 0x24c   :  { %876 = vmatprep.subr.bf16.mxu0 %v2070_v51  ;;  %1630 = vmatprep.subr.bf16.mxu1 %v2589_v17 }
 0x24f   :  { %877 = vmatpush1.bf16.msra.mxu0 %v2085_v53  ;;  %1631 = vmatpush3.bf16.msra.mxu1 %v2117_v58 }
 0x250   :  { %878 = vmatprep.subr.bf16.mxu0 %v2092_v54  ;;  %1632 = vmatprep.subr.bf16.mxu1 %v2589_v17 }
 0x253   :  { %879 = vmatpush1.bf16.msra.mxu0 %v2105_v56  ;;  %1633 = vmatpush3.bf16.msra.mxu1 %v2132_v60 }
 0x254   :  { %880 = vmatprep.subr.bf16.mxu0 %v2111_v57  ;;  %1634 = vmatprep.subr.bf16.mxu1 %v2589_v17 }
 0x257   :  { %881 = vmatpush1.bf16.msra.mxu0 %v2124_v59  ;;  %1635 = vmatpush3.bf16.msra.mxu1 %v2141_v61 }
 0x258   :  { %972 = vmatprep.subr.bf16.mxu0 %v1968_v27  ;;  %1640 = vmatprep.subr.bf16.mxu1 %v2589_v17 }
 0x30d   :  { %v794_v26 = vpop.f32.mrb[24].mxu0  ;;  %v835_v0 = vpop.f32.mrb[16].mxu1 }
 0x30e   :  { %v841_v8 = vadd.f32 %v794_v26, %v2193_v20  ;;  %v796_v39 = vpop.f32.mrb[25].mxu0  ;;  %v1618_v1 = vpop.f32.mrb[17].mxu1  ;;  %v851_v14 = vadd.f32 %v2238_v23, %v835_v0 }
 0x30f   :  { %v846_v38 = vadd.f32 %v796_v39, %v2198_v24  ;;  %v798_v63 = vpop.f32.mrb[26].mxu0  ;;  %v838_v36 = vpop.f32.mrb[18].mxu1 }
 0x310   :  { %v842_v21 = vmul.f32 0.5, %v841_v8  ;;  %v799_v41 = vpop.f32.mrb[27].mxu0  ;;  %v1619_v46 = vpop.f32.mrb[19].mxu1 }
 0x311   :  { %v847_v62 = vmul.f32 0.5, %v846_v38 }
 0x312   :  { %1800 = vtanh.f32 %v842_v21 }
 0x313   :  { %1802 = vtanh.f32 %v847_v62 }
 0x31c   :  { %v1801_v13 = vpop.eup %1800 }
 0x31d   :  { %v844_v11 = vadd.f32 1.0, %v1801_v13  ;;  %v1803_v7 = vpop.eup %1802 }
 0x31e   :  { %v849_v19 = vadd.f32 1.0, %v1803_v7 }
 0x31f   :  { %v845_v10 = vmul.f32 0.5, %v844_v11 }
 0x320   :  { %v850_v24 = vmul.f32 0.5, %v849_v19 }
 0x321   :  { %v852_v6 = vmul.f32 %v851_v14, %v845_v10 }
 0x322   :  { %v855_v9 = vsub.f32 1.0, %v850_v24  ;;  %v857_v8 = vmul.f32 %v850_v24, %v2290_v32 }
 0x323   :  { %v853_v20 = vadd.f32 %v852_v6, %v2191_v16 }
 0x325   :  { %1804 = vtanh.f32 %v853_v20 }
 0x32f   :  { %v1805_v15 = vpop.eup %1804 }
 0x330   :  { %v856_v26 = vmul.f32 %v1805_v15, %v855_v9 }
 0x332   :  { %v2338_v39 = vadd.f32 %v857_v8, %v856_v26 }
 0x334   :  { %1446 = vst [vmem:[%s2581_s5 + $0x10] sm:$0xff] %v2338_v39  ;;  %v865_v0 = vpack.c.bf16 %v2338_v39, %v2338_v39 }
 0x336   :  { %899 = vmatmul.mubr.bf16.vlgmr.msra.gmra.mrb[28].mxu0 %v865_v0  ;;  %1637 = vmatmul.mubr.bf16.vlgmr.msra.gmra.mrb[20].mxu1 %v865_v0 }
 0x337   :  { %973 = vmatpush1.bf16.msra.mxu0 %v1976_v29  ;;  %1641 = vmatpush3.bf16.msra.mxu1 %v2012_v37 }
 0x338   :  { %974 = vmatprep.subr.bf16.mxu0 %v1982_v30  ;;  %1642 = vmatprep.subr.bf16.mxu1 %v2589_v17 }
 0x339   :  { %1004 = vmatprep.mubr.bf16.mxu0 %v2590_v3  ;;  %1656 = vmatprep.mubr.msk.bf16.mxu1 %vm1857_vm0, %v2589_v17 }
 0x33b   :  { %975 = vmatpush1.bf16.msra.mxu0 %v1987_v31  ;;  %1643 = vmatpush3.bf16.msra.mxu1 %v2031_v43 }
 0x33c   :  { %976 = vmatprep.subr.bf16.mxu0 %v2000_v34  ;;  %1644 = vmatprep.subr.bf16.mxu1 %v2589_v17 }
 0x33f   :  { %977 = vmatpush1.bf16.msra.mxu0 %v2019_v40  ;;  %1645 = vmatpush3.bf16.msra.mxu1 %v2057_v48 }
 0x340   :  { %978 = vmatprep.subr.bf16.mxu0 %v2025_v42  ;;  %1646 = vmatprep.subr.bf16.mxu1 %v2589_v17 }
 0x343   :  { %979 = vmatpush1.bf16.msra.mxu0 %v2038_v44  ;;  %1647 = vmatpush3.bf16.msra.mxu1 %v2076_v52 }
 0x344   :  { %980 = vmatprep.subr.bf16.mxu0 %v2051_v47  ;;  %1648 = vmatprep.subr.bf16.mxu1 %v2589_v17 }
 0x347   :  { %981 = vmatpush1.bf16.msra.mxu0 %v2064_v50  ;;  %1649 = vmatpush3.bf16.msra.mxu1 %v2098_v55 }
 0x348   :  { %982 = vmatprep.subr.bf16.mxu0 %v2070_v51  ;;  %1650 = vmatprep.subr.bf16.mxu1 %v2589_v17 }
 0x34b   :  { %983 = vmatpush1.bf16.msra.mxu0 %v2085_v53  ;;  %1651 = vmatpush3.bf16.msra.mxu1 %v2117_v58 }
 0x34c   :  { %984 = vmatprep.subr.bf16.mxu0 %v2092_v54  ;;  %1652 = vmatprep.subr.bf16.mxu1 %v2589_v17 }
 0x34f   :  { %985 = vmatpush1.bf16.msra.mxu0 %v2105_v56  ;;  %1653 = vmatpush3.bf16.msra.mxu1 %v2132_v60 }
 0x350   :  { %986 = vmatprep.subr.bf16.mxu0 %v2111_v57  ;;  %1654 = vmatprep.subr.bf16.mxu1 %v2589_v17 }
 0x353   :  { %987 = vmatpush1.bf16.msra.mxu0 %v2124_v59  ;;  %1655 = vmatpush3.bf16.msra.mxu1 %v2141_v61 }
 0x354   :  { %1078 = vmatprep.subr.bf16.mxu0 %v1968_v27  ;;  %1660 = vmatprep.subr.bf16.mxu1 %v2589_v17 }
 0x409   :  { %v900_v16 = vpop.f32.mrb[28].mxu0  ;;  %v941_v32 = vpop.f32.mrb[20].mxu1 }
 0x40a   :  { %v947_v1 = vadd.f32 %v900_v16, %v2203_v28  ;;  %v902_v38 = vpop.f32.mrb[29].mxu0  ;;  %v1638_v63 = vpop.f32.mrb[21].mxu1  ;;  %v957_v7 = vadd.f32 %v2238_v23, %v941_v32 }
 0x40b   :  { %v952_v36 = vadd.f32 %v902_v38, %v2205_v33  ;;  %v904_v21 = vpop.f32.mrb[30].mxu0  ;;  %v944_v41 = vpop.f32.mrb[22].mxu1 }
 0x40c   :  { %v948_v46 = vmul.f32 0.5, %v947_v1  ;;  %v905_v62 = vpop.f32.mrb[31].mxu0  ;;  %v1639_v13 = vpop.f32.mrb[23].mxu1 }
 0x40d   :  { %v953_v11 = vmul.f32 0.5, %v952_v36 }
 0x40e   :  { %1806 = vtanh.f32 %v948_v46 }
 0x40f   :  { %1808 = vtanh.f32 %v953_v11 }
 0x418   :  { %v1807_v10 = vpop.eup %1806 }
 0x419   :  { %v950_v14 = vadd.f32 1.0, %v1807_v10  ;;  %v1809_v19 = vpop.eup %1808 }
 0x41a   :  { %v955_v24 = vadd.f32 1.0, %v1809_v19 }
 0x41b   :  { %v951_v6 = vmul.f32 0.5, %v950_v14 }
 0x41c   :  { %v956_v33 = vmul.f32 0.5, %v955_v24 }
 0x41d   :  { %v958_v20 = vmul.f32 %v957_v7, %v951_v6 }
 0x41e   :  { %v961_v9 = vsub.f32 1.0, %v956_v33  ;;  %v963_v8 = vmul.f32 %v956_v33, %v2338_v39 }
 0x41f   :  { %v959_v28 = vadd.f32 %v958_v20, %v2196_v22 }
 0x421   :  { %1810 = vtanh.f32 %v959_v28 }
 0x42b   :  { %v1811_v15 = vpop.eup %1810 }
 0x42c   :  { %v962_v26 = vmul.f32 %v1811_v15, %v961_v9 }
 0x42e   :  { %v2386_v0 = vadd.f32 %v963_v8, %v962_v26 }
 0x430   :  { %1447 = vst [vmem:[%s2581_s5 + $0x18] sm:$0xff] %v2386_v0  ;;  %v971_v16 = vpack.c.bf16 %v2386_v0, %v2386_v0 }
 0x432   :  { %1005 = vmatmul.mubr.bf16.vlgmr.msra.gmra.mrb[32].mxu0 %v971_v16  ;;  %1657 = vmatmul.mubr.bf16.vlgmr.msra.gmra.mrb[24].mxu1 %v971_v16 }
 0x433   :  { %1079 = vmatpush1.bf16.msra.mxu0 %v1976_v29  ;;  %1661 = vmatpush3.bf16.msra.mxu1 %v2012_v37 }
 0x434   :  { %1080 = vmatprep.subr.bf16.mxu0 %v1982_v30  ;;  %1662 = vmatprep.subr.bf16.mxu1 %v2589_v17 }
 0x435   :  { %1110 = vmatprep.mubr.bf16.mxu0 %v2590_v3  ;;  %1676 = vmatprep.mubr.msk.bf16.mxu1 %vm1857_vm0, %v2589_v17 }
 0x437   :  { %1081 = vmatpush1.bf16.msra.mxu0 %v1987_v31  ;;  %1663 = vmatpush3.bf16.msra.mxu1 %v2031_v43 }
 0x438   :  { %1082 = vmatprep.subr.bf16.mxu0 %v2000_v34  ;;  %1664 = vmatprep.subr.bf16.mxu1 %v2589_v17 }
 0x43b   :  { %1083 = vmatpush1.bf16.msra.mxu0 %v2019_v40  ;;  %1665 = vmatpush3.bf16.msra.mxu1 %v2057_v48 }
 0x43c   :  { %1084 = vmatprep.subr.bf16.mxu0 %v2025_v42  ;;  %1666 = vmatprep.subr.bf16.mxu1 %v2589_v17 }
 0x43f   :  { %1085 = vmatpush1.bf16.msra.mxu0 %v2038_v44  ;;  %1667 = vmatpush3.bf16.msra.mxu1 %v2076_v52 }
 0x440   :  { %1086 = vmatprep.subr.bf16.mxu0 %v2051_v47  ;;  %1668 = vmatprep.subr.bf16.mxu1 %v2589_v17 }
 0x443   :  { %1087 = vmatpush1.bf16.msra.mxu0 %v2064_v50  ;;  %1669 = vmatpush3.bf16.msra.mxu1 %v2098_v55 }
 0x444   :  { %1088 = vmatprep.subr.bf16.mxu0 %v2070_v51  ;;  %1670 = vmatprep.subr.bf16.mxu1 %v2589_v17 }
 0x447   :  { %1089 = vmatpush1.bf16.msra.mxu0 %v2085_v53  ;;  %1671 = vmatpush3.bf16.msra.mxu1 %v2117_v58 }
 0x448   :  { %1090 = vmatprep.subr.bf16.mxu0 %v2092_v54  ;;  %1672 = vmatprep.subr.bf16.mxu1 %v2589_v17 }
 0x44b   :  { %1091 = vmatpush1.bf16.msra.mxu0 %v2105_v56  ;;  %1673 = vmatpush3.bf16.msra.mxu1 %v2132_v60 }
 0x44c   :  { %1092 = vmatprep.subr.bf16.mxu0 %v2111_v57  ;;  %1674 = vmatprep.subr.bf16.mxu1 %v2589_v17 }
 0x44f   :  { %1093 = vmatpush1.bf16.msra.mxu0 %v2124_v59  ;;  %1675 = vmatpush3.bf16.msra.mxu1 %v2141_v61 }
 0x450   :  { %1184 = vmatprep.subr.bf16.mxu0 %v1968_v27  ;;  %1680 = vmatprep.subr.bf16.mxu1 %v2589_v17 }
 0x505   :  { %v1006_v22 = vpop.f32.mrb[32].mxu0  ;;  %v1047_v39 = vpop.f32.mrb[24].mxu1 }
 0x506   :  { %v1053_v32 = vadd.f32 %v1006_v22, %v2213_v49  ;;  %v1008_v1 = vpop.f32.mrb[33].mxu0  ;;  %v1658_v38 = vpop.f32.mrb[25].mxu1  ;;  %v1063_v14 = vadd.f32 %v2238_v23, %v1047_v39 }
 0x507   :  { %v1058_v63 = vadd.f32 %v1008_v1, %v2218_v2  ;;  %v1010_v36 = vpop.f32.mrb[34].mxu0  ;;  %v1050_v21 = vpop.f32.mrb[26].mxu1  ;;  %v1838_v1 = vld [vmem:[%s2578_s2 + $0x8] ss:$12 sps:$4 sm:$0xff]  }
 0x508   :  { %v1054_v41 = vmul.f32 0.5, %v1053_v32  ;;  %v1011_v46 = vpop.f32.mrb[35].mxu0  ;;  %v1659_v62 = vpop.f32.mrb[27].mxu1  ;;  %v1839_v38 = vld [vmem:[%s2578_s2 + $0x1c] ss:$12 sps:$4 sm:$0xff]  }
 0x509   :  { %v1059_v13 = vmul.f32 0.5, %v1058_v63  ;;  %v1840_v63 = vld [vmem:[%s2578_s2 + $0x18] ss:$12 sps:$4 sm:$0xff]   ;;  %v1841_v36 = vld [vmem:[%s2578_s2 + $0x20] ss:$12 sps:$4 sm:$0xff]  }
 0x50a   :  { %1812 = vtanh.f32 %v1054_v41  ;;  %v1842_v21 = vld [vmem:[%s2578_s2 + $0x34] ss:$12 sps:$4 sm:$0xff]   ;;  %v1844_v41 = vld [vmem:[%s2578_s2 + $0x38] ss:$12 sps:$4 sm:$0xff]  }
 0x50b   :  { %1814 = vtanh.f32 %v1059_v13  ;;  %v1845_v46 = vld [vmem:[%s2578_s2 + $0x4c] ss:$12 sps:$4 sm:$0xff]   ;;  %v1846_v62 = vld [vmem:[%s2578_s2 + $0x48] ss:$12 sps:$4 sm:$0xff]   ;;  %v1847_v13 = vld [vmem:[%s2578_s2 + $0x50] ss:$12 sps:$4 sm:$0xff]  }
 0x514   :  { %v1813_v11 = vpop.eup %1812 }
 0x515   :  { %v1056_v27 = vadd.f32 1.0, %v1813_v11  ;;  %v1815_v7 = vpop.eup %1814  ;;  %v1848_v11 = vld [vmem:[%s2578_s2 + $0x64] ss:$12 sps:$4 sm:$0xff]  }
 0x516   :  { %v1061_v20 = vadd.f32 1.0, %v1815_v7  ;;  %v1854_v7 = vld [vmem:[%s2578_s2 + $0xac] ss:$12 sps:$4 sm:$0xff]  }
 0x517   :  { %v1057_v10 = vmul.f32 0.5, %v1056_v27  ;;  %v1849_v27 = vld [vmem:[%s2578_s2 + $0x60] ss:$12 sps:$4 sm:$0xff]  }
 0x518   :  { %v1062_v2 = vmul.f32 0.5, %v1061_v20 }
 0x519   :  { %v1064_v6 = vmul.f32 %v1063_v14, %v1057_v10  ;;  %v1850_v10 = vld [vmem:[%s2578_s2 + $0x7c] ss:$12 sps:$4 sm:$0xff]   ;;  %v1851_v14 = vld [vmem:[%s2578_s2 + $0x78] ss:$12 sps:$4 sm:$0xff]  }
 0x51a   :  { %v1067_v19 = vsub.f32 1.0, %v1062_v2  ;;  %v1069_v33 = vmul.f32 %v1062_v2, %v2386_v0 }
 0x51b   :  { %v1065_v49 = vadd.f32 %v1064_v6, %v2211_v45  ;;  %v1852_v6 = vld [vmem:[%s2578_s2 + $0x94] ss:$12 sps:$4 sm:$0xff]  }
 0x51d   :  { %1816 = vtanh.f32 %v1065_v49 }
 0x527   :  { %v1817_v28 = vpop.eup %1816 }
 0x528   :  { %v1068_v24 = vmul.f32 %v1817_v28, %v1067_v19  ;;  %v2591_v28 = vld [vmem:[#allocation6_spill] sm:$0xff] }
 0x52a   :  { %v2434_v9 = vadd.f32 %v1069_v33, %v1068_v24 }
 0x52c   :  { %1448 = vst [vmem:[%s2581_s5 + $0x20] sm:$0xff] %v2434_v9  ;;  %v1077_v15 = vpack.c.bf16 %v2434_v9, %v2434_v9 }
 0x52e   :  { %1111 = vmatmul.mubr.bf16.vlgmr.msra.gmra.mrb[36].mxu0 %v1077_v15  ;;  %1677 = vmatmul.mubr.bf16.vlgmr.msra.gmra.mrb[28].mxu1 %v1077_v15 }
 0x52f   :  { %1185 = vmatpush1.bf16.msra.mxu0 %v1976_v29  ;;  %1681 = vmatpush3.bf16.msra.mxu1 %v2012_v37  ;;  %v1836_v29 = vld [vmem:[%s2578_s2 + $0x4] ss:$12 sps:$4 sm:$0xff]  }
 0x530   :  { %1186 = vmatprep.subr.bf16.mxu0 %v1982_v30  ;;  %1682 = vmatprep.subr.bf16.mxu1 %v2589_v17 }
 0x531   :  { %1216 = vmatprep.mubr.bf16.mxu0 %v2590_v3  ;;  %1696 = vmatprep.mubr.msk.bf16.mxu1 %vm1857_vm0, %v2589_v17 }
 0x533   :  { %1187 = vmatpush1.bf16.msra.mxu0 %v1987_v31  ;;  %1683 = vmatpush3.bf16.msra.mxu1 %v2031_v43 }
 0x534   :  { %1188 = vmatprep.subr.bf16.mxu0 %v2000_v34  ;;  %1684 = vmatprep.subr.bf16.mxu1 %v2589_v17 }
 0x537   :  { %1189 = vmatpush1.bf16.msra.mxu0 %v2019_v40  ;;  %1685 = vmatpush3.bf16.msra.mxu1 %v2057_v48 }
 0x538   :  { %1190 = vmatprep.subr.bf16.mxu0 %v2025_v42  ;;  %1686 = vmatprep.subr.bf16.mxu1 %v2589_v17 }
 0x53b   :  { %1191 = vmatpush1.bf16.msra.mxu0 %v2038_v44  ;;  %1687 = vmatpush3.bf16.msra.mxu1 %v2076_v52 }
 0x53c   :  { %1192 = vmatprep.subr.bf16.mxu0 %v2051_v47  ;;  %1688 = vmatprep.subr.bf16.mxu1 %v2589_v17 }
 0x53f   :  { %1193 = vmatpush1.bf16.msra.mxu0 %v2064_v50  ;;  %1689 = vmatpush3.bf16.msra.mxu1 %v2098_v55 }
 0x540   :  { %1194 = vmatprep.subr.bf16.mxu0 %v2070_v51  ;;  %1690 = vmatprep.subr.bf16.mxu1 %v2589_v17 }
 0x543   :  { %1195 = vmatpush1.bf16.msra.mxu0 %v2085_v53  ;;  %1691 = vmatpush3.bf16.msra.mxu1 %v2117_v58 }
 0x544   :  { %1196 = vmatprep.subr.bf16.mxu0 %v2092_v54  ;;  %1692 = vmatprep.subr.bf16.mxu1 %v2589_v17 }
 0x547   :  { %1197 = vmatpush1.bf16.msra.mxu0 %v2105_v56  ;;  %1693 = vmatpush3.bf16.msra.mxu1 %v2132_v60 }
 0x548   :  { %1198 = vmatprep.subr.bf16.mxu0 %v2111_v57  ;;  %1694 = vmatprep.subr.bf16.mxu1 %v2589_v17 }
 0x54b   :  { %1199 = vmatpush1.bf16.msra.mxu0 %v2124_v59  ;;  %1695 = vmatpush3.bf16.msra.mxu1 %v2141_v61 }
 0x54c   :  { %1290 = vmatprep.subr.bf16.mxu0 %v1836_v29  ;;  %1700 = vmatprep.subr.bf16.mxu1 %v2589_v17 }
 0x601   :  { %v1112_v30 = vpop.f32.mrb[36].mxu0  ;;  %v1153_v31 = vpop.f32.mrb[28].mxu1 }
 0x602   :  { %v1159_v34 = vadd.f32 %v1112_v30, %v2223_v5  ;;  %v1114_v37 = vpop.f32.mrb[37].mxu0  ;;  %v1678_v40 = vpop.f32.mrb[29].mxu1  ;;  %v1169_v56 = vadd.f32 %v2238_v23, %v1153_v31 }
 0x603   :  { %v1164_v42 = vadd.f32 %v1114_v37, %v2225_v12  ;;  %v1116_v43 = vpop.f32.mrb[38].mxu0  ;;  %v1156_v44 = vpop.f32.mrb[30].mxu1 }
 0x604   :  { %v1160_v47 = vmul.f32 0.5, %v1159_v34  ;;  %v1117_v48 = vpop.f32.mrb[39].mxu0  ;;  %v1679_v50 = vpop.f32.mrb[31].mxu1 }
 0x605   :  { %v1165_v51 = vmul.f32 0.5, %v1164_v42 }
 0x606   :  { %1818 = vtanh.f32 %v1160_v47 }
 0x607   :  { %1820 = vtanh.f32 %v1165_v51 }
 0x610   :  { %v1819_v52 = vpop.eup %1818 }
 0x611   :  { %v1162_v53 = vadd.f32 1.0, %v1819_v52  ;;  %v1821_v45 = vpop.eup %1820 }
 0x612   :  { %v1167_v26 = vadd.f32 1.0, %v1821_v45 }
 0x613   :  { %v1163_v54 = vmul.f32 0.5, %v1162_v53 }
 0x614   :  { %v1168_v12 = vmul.f32 0.5, %v1167_v26 }
 0x615   :  { %v1170_v57 = vmul.f32 %v1169_v56, %v1163_v54 }
 0x616   :  { %v1173_v8 = vsub.f32 1.0, %v1168_v12  ;;  %v1175_v22 = vmul.f32 %v1168_v12, %v2434_v9 }
 0x617   :  { %v1171_v5 = vadd.f32 %v1170_v57, %v2221_v4  ;;  %v1837_v4 = vld [vmem:[%s2578_s2] ss:$12 sps:$4 sm:$0xff]  }
 0x619   :  { %1822 = vtanh.f32 %v1171_v5 }
 0x623   :  { %v1823_v0 = vpop.eup %1822 }
 0x624   :  { %v1174_v16 = vmul.f32 %v1823_v0, %v1173_v8 }
 0x626   :  { %v2484_v39 = vadd.f32 %v1175_v22, %v1174_v16 }
 0x628   :  { %1449 = vst [vmem:[%s2581_s5 + $0x28] sm:$0xff] %v2484_v39  ;;  %v1183_v32 = vpack.c.bf16 %v2484_v39, %v2484_v39 }
 0x62a   :  { %1217 = vmatmul.mubr.bf16.vlgmr.msra.gmra.mrb[40].mxu0 %v1183_v32  ;;  %1697 = vmatmul.mubr.bf16.vlgmr.msra.gmra.mrb[32].mxu1 %v1183_v32 }
 0x62b   :  { %1291 = vmatpush1.bf16.msra.mxu0 %v1837_v4  ;;  %1701 = vmatpush3.bf16.msra.mxu1 %v1838_v1 }
 0x62c   :  { %1292 = vmatprep.subr.bf16.mxu0 %v1839_v38  ;;  %1702 = vmatprep.subr.bf16.mxu1 %v2589_v17 }
 0x62d   :  { %1322 = vmatprep.mubr.bf16.mxu0 %v2590_v3  ;;  %1716 = vmatprep.mubr.msk.bf16.mxu1 %vm1857_vm0, %v2589_v17  ;;  %v1843_v3 = vld [vmem:[%s2578_s2 + $0x30] ss:$12 sps:$4 sm:$0xff]  }
 0x62f   :  { %1293 = vmatpush1.bf16.msra.mxu0 %v1840_v63  ;;  %1703 = vmatpush3.bf16.msra.mxu1 %v1841_v36 }
 0x630   :  { %1294 = vmatprep.subr.bf16.mxu0 %v1842_v21  ;;  %1704 = vmatprep.subr.bf16.mxu1 %v2589_v17 }
 0x633   :  { %1295 = vmatpush1.bf16.msra.mxu0 %v1843_v3  ;;  %1705 = vmatpush3.bf16.msra.mxu1 %v1844_v41 }
 0x634   :  { %1296 = vmatprep.subr.bf16.mxu0 %v1845_v46  ;;  %1706 = vmatprep.subr.bf16.mxu1 %v2589_v17 }
 0x637   :  { %1297 = vmatpush1.bf16.msra.mxu0 %v1846_v62  ;;  %1707 = vmatpush3.bf16.msra.mxu1 %v1847_v13 }
 0x638   :  { %1298 = vmatprep.subr.bf16.mxu0 %v1848_v11  ;;  %1708 = vmatprep.subr.bf16.mxu1 %v2589_v17 }
 0x63b   :  { %1299 = vmatpush1.bf16.msra.mxu0 %v1849_v27  ;;  %1709 = vmatpush3.bf16.msra.mxu1 %v2098_v55  ;;  %v1853_v55 = vld [vmem:[%s2578_s2 + $0x90] ss:$12 sps:$4 sm:$0xff]  }
 0x63c   :  { %1300 = vmatprep.subr.bf16.mxu0 %v1850_v10  ;;  %1710 = vmatprep.subr.bf16.mxu1 %v2589_v17 }
 0x63f   :  { %1301 = vmatpush1.bf16.msra.mxu0 %v1851_v14  ;;  %1711 = vmatpush3.bf16.msra.mxu1 %v2117_v58 }
 0x640   :  { %1302 = vmatprep.subr.bf16.mxu0 %v1852_v6  ;;  %1712 = vmatprep.subr.bf16.mxu1 %v2589_v17 }
 0x643   :  { %1303 = vmatpush1.bf16.msra.mxu0 %v1853_v55  ;;  %1713 = vmatpush3.bf16.msra.mxu1 %v2132_v60 }
 0x644   :  { %1304 = vmatprep.subr.bf16.mxu0 %v1854_v7  ;;  %1714 = vmatprep.subr.bf16.mxu1 %v2589_v17 }
 0x647   :  { %1305 = vmatpush1.bf16.msra.mxu0 %v2124_v59  ;;  %1715 = vmatpush3.bf16.msra.mxu1 %v2141_v61 }
 0x6fd   :  { %v1218_v58 = vpop.f32.mrb[40].mxu0  ;;  %v1259_v49 = vpop.f32.mrb[32].mxu1 }
 0x6fe   :  { %v1265_v20 = vadd.f32 %v1218_v58, %v2227_v18  ;;  %v1220_v2 = vpop.f32.mrb[41].mxu0  ;;  %v1698_v19 = vpop.f32.mrb[33].mxu1  ;;  %v1275_v61 = vadd.f32 %v2238_v23, %v1259_v49  ;;  %v2592_v18 = vld [vmem:[#allocation4_spill] sm:$0xff] }
 0x6ff   :  { %v1270_v24 = vadd.f32 %v1220_v2, %v2591_v28  ;;  %v1222_v60 = vpop.f32.mrb[42].mxu0  ;;  %v1262_v33 = vpop.f32.mrb[34].mxu1 }
 0x700   :  { %v1266_v9 = vmul.f32 0.5, %v1265_v20  ;;  %v1223_v15 = vpop.f32.mrb[43].mxu0  ;;  %v1699_v29 = vpop.f32.mrb[35].mxu1 }
 0x701   :  { %v1271_v30 = vmul.f32 0.5, %v1270_v24 }
 0x702   :  { %1824 = vtanh.f32 %v1266_v9 }
 0x703   :  { %1826 = vtanh.f32 %v1271_v30 }
 0x70c   :  { %v1825_v17 = vpop.eup %1824 }
 0x70d   :  { %v1268_v59 = vadd.f32 1.0, %v1825_v17  ;;  %v1827_v37 = vpop.eup %1826 }
 0x70e   :  { %v1273_v42 = vadd.f32 1.0, %v1827_v37 }
 0x70f   :  { %v1269_v31 = vmul.f32 0.5, %v1268_v59 }
 0x710   :  { %v1274_v43 = vmul.f32 0.5, %v1273_v42 }
 0x711   :  { %v1276_v34 = vmul.f32 %v1275_v61, %v1269_v31 }
 0x712   :  { %v1279_v44 = vsub.f32 1.0, %v1274_v43  ;;  %v1281_v50 = vmul.f32 %v1274_v43, %v2484_v39 }
 0x713   :  { %v1277_v40 = vadd.f32 %v1276_v34, %v2592_v18 }
 0x715   :  { %1828 = vtanh.f32 %v1277_v40 }
 0x71f   :  { %v1829_v47 = vpop.eup %1828 }
 0x720   :  { %v1280_v48 = vmul.f32 %v1829_v47, %v1279_v44 }
 0x722   :  { %v1282_v51 = vadd.f32 %v1281_v50, %v1280_v48 }
 0x724   :  { %1450 = vst [vmem:[%s2581_s5 + $0x30] sm:$0xff] %v1282_v51  ;;  %v1289_v52 = vpack.c.bf16 %v1282_v51, %v1282_v51 }
 0x726   :  { %1323 = vmatmul.mubr.bf16.vlgmr.msra.gmra.mrb[44].mxu0 %v1289_v52  ;;  %1717 = vmatmul.mubr.bf16.vlgmr.msra.gmra.mrb[36].mxu1 %v1289_v52 }
 0x7f9   :  { %v1324_v53 = vpop.f32.mrb[44].mxu0  ;;  %v1365_v54 = vpop.f32.mrb[36].mxu1 }
 0x7fa   :  { %v1371_v56 = vadd.f32 %v1324_v53, %v2231_v25  ;;  %v1326_v57 = vpop.f32.mrb[45].mxu0  ;;  %v1718_v45 = vpop.f32.mrb[37].mxu1  ;;  %v1381_v1 = vadd.f32 %v2238_v23, %v1365_v54  ;;  %v2593_v25 = vld [vmem:[#allocation5_spill] sm:$0xff] }
 0x7fb   :  { %v1376_v5 = vadd.f32 %v1326_v57, %v2233_v35  ;;  %v1328_v26 = vpop.f32.mrb[46].mxu0  ;;  %v1368_v12 = vpop.f32.mrb[38].mxu1 }
 0x7fc   :  { %v1372_v8 = vmul.f32 0.5, %v1371_v56  ;;  %v1329_v0 = vpop.f32.mrb[47].mxu0  ;;  %v1719_v16 = vpop.f32.mrb[39].mxu1 }
 0x7fd   :  { %v1377_v22 = vmul.f32 0.5, %v1376_v5 }
 0x7fe   :  { %1830 = vtanh.f32 %v1372_v8 }
 0x7ff   :  { %1832 = vtanh.f32 %v1377_v22 }
 0x808   :  { %v1831_v39 = vpop.eup %1830 }
 0x809   :  { %v1374_v32 = vadd.f32 1.0, %v1831_v39  ;;  %v1833_v63 = vpop.eup %1832 }
 0x80a   :  { %v1379_v21 = vadd.f32 1.0, %v1833_v63 }
 0x80b   :  { %v1375_v4 = vmul.f32 0.5, %v1374_v32 }
 0x80c   :  { %v1380_v35 = vmul.f32 0.5, %v1379_v21 }
 0x80d   :  { %v1382_v38 = vmul.f32 %v1381_v1, %v1375_v4 }
 0x80e   :  { %v1385_v3 = vsub.f32 1.0, %v1380_v35  ;;  %v1387_v62 = vmul.f32 %v1380_v35, %v1282_v51 }
 0x80f   :  { %v1383_v36 = vadd.f32 %v1382_v38, %v2593_v25 }
 0x811   :  { %1834 = vtanh.f32 %v1383_v36 }
 0x81b   :  { %v1835_v41 = vpop.eup %1834 }
 0x81c   :  { %v1386_v46 = vmul.f32 %v1835_v41, %v1385_v3 }
 0x81e   :  { %v1388_v13 = vadd.f32 %v1387_v62, %v1386_v46 }
 0x820   :  { %1451 = vst [vmem:[%s2581_s5 + $0x38] sm:$0xff] %v1388_v13 }

</bundles_post_ra>
